<compile_context>
chip_gen: v6e
topology: v6e:2x2x1
jax: 0.10.0
libtpu: 0.0.40
codegen_flags: <defaults>
</compile_context>

<pallas_src>
import functools

import jax
import jax.numpy as jnp
from jax.experimental import pallas as pl
from jax.experimental.pallas import tpu as pltpu


# ---------------- synthetic SHINEConfig-equivalent hyperparameters ----------------
FEATURE_DIM = 8          # config.feature_dim
SEM_CLASS_COUNT = 3      # config.sem_class_count  -> num_classes = 4
NUM_CLASSES = SEM_CLASS_COUNT + 1
MLP_HIDDEN = 32          # config.geo_mlp_hidden_dim
MLP_LEVEL = 2            # config.geo_mlp_level
MLP_BIAS_ON = True       # config.geo_mlp_bias_on
# use_pe / use_gaussian_pe = False -> input_layer_count = FEATURE_DIM + NUM_CLASSES

TN = 1024                # default batch tile (lanes per grid step); clamped below


def _decoder_kernel(num_hidden_layers, lbl_ref, x_ref, *refs):
    """refs = (w0_packed, [wk_packed ...], wout_packed, o_ref).

    Packed weight layout (all transposed, bias as the trailing column):
      w0_packed   : (H, F + C + 1)  = [W0_feat | W0_onehot | b0]
      wk_packed   : (H, H + 1)      = [Wk | bk]
      wout_packed : (1, H + 1)      = [W_out | b_out]
    """
    o_ref = refs[-1]
    w_refs = refs[:-1]

    x = x_ref[...]                                   # (TN, F) f32, natural (N,F) layout
    lbl = lbl_ref[...]                               # (1, TN) int32, lane-dense
    tn = lbl.shape[1]

    w0 = w_refs[0][...]                              # (H, F + C + 1)

    # ---- layer 0, feature part: MXU dot contracting over F of both operands,
    #      so the batch-sized operand is used in its untransposed (TN, F) form.
    h = jax.lax.dot_general(
        w0[:, :FEATURE_DIM], x,
        dimension_numbers=(((1,), (1,)), ((), ())),
        preferred_element_type=jnp.float32)          # (H, TN)

    # ---- layer 0, one-hot + bias part, also on the MXU:
    #      rows 0..C-1 are indicator(label == c), row C is a constant 1 so the
    #      packed bias column is always added (out-of-range labels therefore get
    #      bias-only behaviour, matching jax.nn.one_hot's all-zero one-hot).
    cls = jax.lax.broadcasted_iota(jnp.int32, (NUM_CLASSES + 1, tn), 0)
    ohb = jnp.where(cls < NUM_CLASSES,
                    (lbl == cls).astype(jnp.float32),
                    jnp.float32(1.0))                # (C + 1, TN)
    h = h + jnp.dot(w0[:, FEATURE_DIM:], ohb,
                    preferred_element_type=jnp.float32)
    h = jnp.maximum(h, 0.0)

    # ---- hidden layers 1..L-1
    for k in range(1, num_hidden_layers):
        wk = w_refs[k][...]                          # (H, H + 1)
        h = jnp.dot(wk[:, :MLP_HIDDEN], h, preferred_element_type=jnp.float32)
        h = jnp.maximum(h + wk[:, MLP_HIDDEN:], 0.0)

    # ---- output head: one scalar per batch column -> lane-dense (1, TN) store
    wout = w_refs[num_hidden_layers][...]            # (1, H + 1)
    out = jnp.dot(wout[:, :MLP_HIDDEN], h, preferred_element_type=jnp.float32)
    o_ref[...] = out + wout[:, MLP_HIDDEN:]          # unmasked, full-lane store


def decoder_oh_forward(feature, semantic_labels, params, *, tn=TN):
    """feature: (N, F) f32, semantic_labels: (N,) int. Returns (N,) f32."""
    N, F = feature.shape
    assert F == FEATURE_DIM

    # Keep >= 2 grid steps when the batch allows (v7x shards the "parallel"
    # axis across its 2 TensorCores) and avoid over-padding tiny batches.
    # The tile always stays a multiple of the 128-lane width.
    tn = min(tn, max(256, 128 * pl.cdiv(pl.cdiv(N, 2), 128)))
    tn = max(128, min(tn, 128 * pl.cdiv(N, 128)))
    grid = (pl.cdiv(N, tn),)                          # partial last block, no pad copy

    x = feature.astype(jnp.float32)                   # (N, F), streamed as-is (no .T)
    lbl = semantic_labels.astype(jnp.int32).reshape(1, N)   # lane-dense labels (free)

    # pack [W | b] per layer, transposed to (out_dim, in_dim + 1)
    # (in a real pipeline these would be pre-packed once outside the call)
    w0_packed = jnp.concatenate([params["w0"].T, params["b0"].T], axis=1)
    packed = [w0_packed]
    for w, b in params["hidden"]:
        packed.append(jnp.concatenate([w.T, b.T], axis=1))
    packed.append(jnp.concatenate([params["w_out"].T, params["b_out"]], axis=1))

    in_specs = [
        pl.BlockSpec((1, tn), lambda i: (0, i)),              # labels (lane-dense)
        pl.BlockSpec((tn, FEATURE_DIM), lambda i: (i, 0)),    # features (TN, F), contiguous DMA
    ] + [pl.BlockSpec(w.shape, lambda i: (0, 0)) for w in packed]  # VMEM-resident weights
    out_spec = pl.BlockSpec((1, tn), lambda i: (0, i))        # lane-dense output

    kernel = functools.partial(_decoder_kernel, MLP_LEVEL)

    out = pl.pallas_call(
        kernel,
        out_shape=jax.ShapeDtypeStruct((1, N), jnp.float32),
        grid_spec=pltpu.PrefetchScalarGridSpec(
            num_scalar_prefetch=0,
            grid=grid,
            in_specs=in_specs,
            out_specs=out_spec,
        ),
        compiler_params=pltpu.CompilerParams(
            dimension_semantics=("parallel",)),
    )(lbl, x, *packed)

    return out[0]                                     # .squeeze(1)


def init_params(key):
    """Deterministic synthetic weights matching DecoderOH.__init__ shapes.

    Weights stored row-major (in_dim, out_dim), i.e. y = x @ W + b (the
    transpose of torch.nn.Linear.weight).
    """
    in_dim = FEATURE_DIM + NUM_CLASSES
    ks = jax.random.split(key, 2 * MLP_LEVEL + 2)
    scale0 = 1.0 / jnp.sqrt(in_dim)
    w0 = jax.random.uniform(ks[0], (in_dim, MLP_HIDDEN), jnp.float32, -scale0, scale0)
    b0 = (jax.random.uniform(ks[1], (1, MLP_HIDDEN), jnp.float32, -scale0, scale0)
          if MLP_BIAS_ON else jnp.zeros((1, MLP_HIDDEN), jnp.float32))
    params = {"w0": w0, "b0": b0, "hidden": []}
    scale_h = 1.0 / jnp.sqrt(MLP_HIDDEN)
    for k in range(1, MLP_LEVEL):
        w = jax.random.uniform(ks[2 * k], (MLP_HIDDEN, MLP_HIDDEN), jnp.float32,
                               -scale_h, scale_h)
        b = (jax.random.uniform(ks[2 * k + 1], (1, MLP_HIDDEN), jnp.float32,
                                -scale_h, scale_h)
             if MLP_BIAS_ON else jnp.zeros((1, MLP_HIDDEN), jnp.float32))
        params["hidden"].append((w, b))
    params["w_out"] = jax.random.uniform(ks[-2], (MLP_HIDDEN, 1), jnp.float32,
                                         -scale_h, scale_h)
    params["b_out"] = (jax.random.uniform(ks[-1], (1, 1), jnp.float32,
                                          -scale_h, scale_h)
                       if MLP_BIAS_ON else jnp.zeros((1, 1), jnp.float32))
    # NOTE: nclass_out head exists in the module but is unused in forward(); omitted.
    return params


def reference_forward(feature, labels, params):
    # Labels outside [0, NUM_CLASSES) yield an all-zero one-hot (jax.nn.one_hot
    # semantics; torch scatter_ would raise) -- same behaviour as the kernel.
    with jax.default_matmul_precision("highest"):
        one_hot = jax.nn.one_hot(labels, NUM_CLASSES, dtype=jnp.float32)
        h = jnp.concatenate([feature, one_hot], axis=1) @ params["w0"] + params["b0"]
        h = jnp.maximum(h, 0.0)
        for w, b in params["hidden"]:
            h = jnp.maximum(h @ w + b, 0.0)
        return (h @ params["w_out"] + params["b_out"])[:, 0]


if __name__ == "__main__":
    key = jax.random.PRNGKey(0)
    k_feat, k_lbl, k_par = jax.random.split(key, 3)

    # deliberately NOT a multiple of the tile -> exercises the partial last block,
    # and > 2 * tile/2 so the grid has several "parallel" steps.
    N = 2050
    feature = jax.random.normal(k_feat, (N, FEATURE_DIM), jnp.float32)
    labels = jax.random.randint(k_lbl, (N,), 0, NUM_CLASSES, jnp.int32)
    params = init_params(k_par)

    out = decoder_oh_forward(feature, labels, params)
    out = jax.block_until_ready(out)

    ref = reference_forward(feature, labels, params)
    assert out.shape == (N,)
    assert jnp.allclose(out, ref, atol=1e-4, rtol=1e-4), \
        float(jnp.max(jnp.abs(out - ref)))

    print("KERNEL_OK")
</pallas_src>

<mosaic_0001>
module attributes {stable_mosaic.version = 11 : i64} {
  func.func @_decoder_kernel(%arg0: i32, %arg1: memref<1x1024xi32, #tpu.memory_space<vmem>>, %arg2: memref<1024x8xf32, #tpu.memory_space<vmem>>, %arg3: memref<32x13xf32, #tpu.memory_space<vmem>>, %arg4: memref<32x33xf32, #tpu.memory_space<vmem>>, %arg5: memref<1x33xf32, #tpu.memory_space<vmem>>, %arg6: memref<1x1024xf32, #tpu.memory_space<vmem>>) attributes {dimension_semantics = [#tpu.dimension_semantics<parallel>], iteration_bounds = array<i64: 3>, scalar_prefetch = 0 : i64, scratch_operands = 0 : i64, tpu.core_type = #tpu.core_type<tc>, window_params = [{transform_indices = @transform_0, window_bounds = array<i64: 1, 1024>}, {transform_indices = @transform_1, window_bounds = array<i64: 1024, 8>}, {pipeline_mode = #tpu.pipeline_mode<synchronous>, transform_indices = @transform_2, window_bounds = array<i64: 32, 13>}, {pipeline_mode = #tpu.pipeline_mode<synchronous>, transform_indices = @transform_3, window_bounds = array<i64: 32, 33>}, {pipeline_mode = #tpu.pipeline_mode<synchronous>, transform_indices = @transform_4, window_bounds = array<i64: 1, 33>}, {transform_indices = @transform_5, window_bounds = array<i64: 1, 1024>}]} {
    %c0 = arith.constant 0 : index
    %c0_0 = arith.constant 0 : index
    %0 = vector.load %arg2[%c0, %c0_0] : memref<1024x8xf32, #tpu.memory_space<vmem>>, vector<1024x8xf32>
    %c0_1 = arith.constant 0 : index
    %c0_2 = arith.constant 0 : index
    %1 = vector.load %arg1[%c0_1, %c0_2] : memref<1x1024xi32, #tpu.memory_space<vmem>>, vector<1x1024xi32>
    %c0_3 = arith.constant 0 : index
    %c0_4 = arith.constant 0 : index
    %2 = vector.load %arg3[%c0_3, %c0_4] : memref<32x13xf32, #tpu.memory_space<vmem>>, vector<32x13xf32>
    %3 = vector.extract_strided_slice %2 {offsets = [0, 0], sizes = [32, 8], strides = [1, 1]} : vector<32x13xf32> to vector<32x8xf32>
    %cst = arith.constant dense<0.000000e+00> : vector<32x1024xf32>
    %4 = tpu.matmul %3, %0, %cst {dimension_numbers = #tpu.dot_dimension_numbers<[1], [1], [0], [0], [0, 0, 1, 0], [], []>} : vector<32x8xf32>, vector<1024x8xf32>, vector<32x1024xf32> -> vector<32x1024xf32>
    %5 = tpu.iota {dimensions = array<i32: 0>} : vector<5x1024xi32>
    %c4_i32 = arith.constant 4 : i32
    %6 = vector.broadcast %c4_i32 : i32 to vector<5x1024xi32>
    %7 = arith.cmpi slt, %5, %6 : vector<5x1024xi32>
    %8 = vector.broadcast %1 : vector<1x1024xi32> to vector<5x1024xi32>
    %9 = arith.cmpi eq, %8, %5 : vector<5x1024xi32>
    %10 = arith.extui %9 : vector<5x1024xi1> to vector<5x1024xi32>
    %11 = arith.sitofp %10 : vector<5x1024xi32> to vector<5x1024xf32>
    %cst_5 = arith.constant 1.000000e+00 : f32
    %12 = vector.broadcast %cst_5 : f32 to vector<5x1024xf32>
    %13 = arith.select %7, %11, %12 : vector<5x1024xi1>, vector<5x1024xf32>
    %14 = vector.extract_strided_slice %2 {offsets = [0, 8], sizes = [32, 5], strides = [1, 1]} : vector<32x13xf32> to vector<32x5xf32>
    %cst_6 = arith.constant dense<0.000000e+00> : vector<32x1024xf32>
    %15 = tpu.matmul %14, %13, %cst_6 {dimension_numbers = #tpu.dot_dimension_numbers<[1], [0], [0], [1], [0, 0, 1, 1], [], []>} : vector<32x5xf32>, vector<5x1024xf32>, vector<32x1024xf32> -> vector<32x1024xf32>
    %16 = arith.addf %4, %15 : vector<32x1024xf32>
    %cst_7 = arith.constant 0.000000e+00 : f32
    %17 = vector.broadcast %cst_7 : f32 to vector<32x1024xf32>
    %18 = arith.maximumf %16, %17 : vector<32x1024xf32>
    %c0_8 = arith.constant 0 : index
    %c0_9 = arith.constant 0 : index
    %19 = vector.load %arg4[%c0_8, %c0_9] : memref<32x33xf32, #tpu.memory_space<vmem>>, vector<32x33xf32>
    %20 = vector.extract_strided_slice %19 {offsets = [0, 0], sizes = [32, 32], strides = [1, 1]} : vector<32x33xf32> to vector<32x32xf32>
    %cst_10 = arith.constant dense<0.000000e+00> : vector<32x1024xf32>
    %21 = tpu.matmul %20, %18, %cst_10 {dimension_numbers = #tpu.dot_dimension_numbers<[1], [0], [0], [1], [0, 0, 1, 1], [], []>} : vector<32x32xf32>, vector<32x1024xf32>, vector<32x1024xf32> -> vector<32x1024xf32>
    %22 = vector.extract_strided_slice %19 {offsets = [0, 32], sizes = [32, 1], strides = [1, 1]} : vector<32x33xf32> to vector<32x1xf32>
    %23 = vector.broadcast %22 : vector<32x1xf32> to vector<32x1024xf32>
    %24 = arith.addf %21, %23 : vector<32x1024xf32>
    %cst_11 = arith.constant 0.000000e+00 : f32
    %25 = vector.broadcast %cst_11 : f32 to vector<32x1024xf32>
    %26 = arith.maximumf %24, %25 : vector<32x1024xf32>
    %c0_12 = arith.constant 0 : index
    %c0_13 = arith.constant 0 : index
    %27 = vector.load %arg5[%c0_12, %c0_13] : memref<1x33xf32, #tpu.memory_space<vmem>>, vector<1x33xf32>
    %28 = vector.extract_strided_slice %27 {offsets = [0, 0], sizes = [1, 32], strides = [1, 1]} : vector<1x33xf32> to vector<1x32xf32>
    %cst_14 = arith.constant dense<0.000000e+00> : vector<1x1024xf32>
    %29 = tpu.matmul %28, %26, %cst_14 {dimension_numbers = #tpu.dot_dimension_numbers<[1], [0], [0], [1], [0, 0, 1, 1], [], []>} : vector<1x32xf32>, vector<32x1024xf32>, vector<1x1024xf32> -> vector<1x1024xf32>
    %30 = vector.extract_strided_slice %27 {offsets = [0, 32], sizes = [1, 1], strides = [1, 1]} : vector<1x33xf32> to vector<1x1xf32>
    %31 = vector.broadcast %30 : vector<1x1xf32> to vector<1x1024xf32>
    %32 = arith.addf %29, %31 : vector<1x1024xf32>
    %c0_15 = arith.constant 0 : index
    %c0_16 = arith.constant 0 : index
    %33 = vector.load %arg6[%c0_15, %c0_16] : memref<1x1024xf32, #tpu.memory_space<vmem>>, vector<1x1024xf32>
    tpu.vector_store %arg6[%c0_15, %c0_16], %32 {strides = array<i32>} : memref<1x1024xf32, #tpu.memory_space<vmem>>, vector<1x1024xf32>,
    return
  }
  func.func @transform_0(%arg0: i32) -> (i32, i32) {
    %c0_i32 = arith.constant 0 : i32
    %c0_i32_0 = arith.constant 0 : i32
    return %c0_i32, %arg0 : i32, i32
  }
  func.func @transform_1(%arg0: i32) -> (i32, i32) {
    %c0_i32 = arith.constant 0 : i32
    %c0_i32_0 = arith.constant 0 : i32
    return %arg0, %c0_i32 : i32, i32
  }
  func.func @transform_2(%arg0: i32) -> (i32, i32) {
    %c0_i32 = arith.constant 0 : i32
    %c0_i32_0 = arith.constant 0 : i32
    %c0_i32_1 = arith.constant 0 : i32
    return %c0_i32, %c0_i32_0 : i32, i32
  }
  func.func @transform_3(%arg0: i32) -> (i32, i32) {
    %c0_i32 = arith.constant 0 : i32
    %c0_i32_0 = arith.constant 0 : i32
    %c0_i32_1 = arith.constant 0 : i32
    return %c0_i32, %c0_i32_0 : i32, i32
  }
  func.func @transform_4(%arg0: i32) -> (i32, i32) {
    %c0_i32 = arith.constant 0 : i32
    %c0_i32_0 = arith.constant 0 : i32
    %c0_i32_1 = arith.constant 0 : i32
    return %c0_i32, %c0_i32_0 : i32, i32
  }
  func.func @transform_5(%arg0: i32) -> (i32, i32) {
    %c0_i32 = arith.constant 0 : i32
    %c0_i32_0 = arith.constant 0 : i32
    return %c0_i32, %arg0 : i32, i32
  }
}

</mosaic_0001>

<bundles_post_ra>
// kernel: tpu_custom_call.1
= control target key start
LH: loop header
LB: loop body
LE: loop exit
PB: predicated region body
PF: predicated region fallthrough
CT: control target
= control target key end

     0   :  { %10 = vsyncpa [#allocation3], 0  ;;  %s3801_s0 = inlined_call_operand.vmem [shape: s32[1,2050], index: 0, kind: input, shape index: {}]   ;;  %s3802_s1 = inlined_call_operand.vmem [shape: f32[2050,8], index: 1, kind: input, shape index: {}]   ;;  %s3803_s2 = inlined_call_operand.vmem [shape: f32[32,13], index: 2, kind: input, shape index: {}]   ;;  %s3804_s3 = inlined_call_operand.vmem [shape: f32[32,33], index: 3, kind: input, shape index: {}]   ;;  %s3805_s4 = inlined_call_operand.vmem [shape: f32[1,33], index: 4, kind: input, shape index: {}]   ;;  %s3806_s5 = inlined_call_operand.hbm [shape: f32[1,2050], index: 5, kind: output, shape index: {}]  }
   0x1   :  { %12 = vsyncpa [#allocation3 + $0x1], 0  ;;  %s3049_s18 = smov 0   ;;  %s3051_s19 = smov 0  }
   0x2   :  { %s3053_s20 = smov 0   ;;  %s3055_s21 = smov 0  }
   0x3 LB: > { %s3070_s22 = sadd.s32 4294967295, %s3012_s21   ;;  %s2536_s23 = sadd.s32 4294967294, %s3012_s21   ;;  %s3012_s21 = sphi %s3055_s21, %s3829_s21   ;;  %s3008_s20 = sphi %s3053_s20, %s3828_s20   ;;  %s3004_s19 = sphi %s3051_s19, %s3827_s19   ;;  %s3000_s18 = sphi %s3049_s18, %s3826_s18  }
   0x4   : > { %s3074_s24 = sadd.s32 1, %s3012_s21   ;;  %s140_s25 = sadd.s32 1, %s3008_s20 }
   0x5   : > { %s137_s26 = ssub.s32 %s3012_s21, %s3074_s24  ;;  %p150_p0 = scmp.ne.s32.totalorder %s3008_s20, %s3004_s19 }
   0x6   : > { %p138_p1 = scmp.eq.s32.totalorder %s137_s26, 0  ;;  %p151_p2 = scmp.eq.s32.totalorder %s3070_s22, 2 }
   0x7   : > { %p156_p3 = scmp.ne.s32.totalorder %s3004_s19, %s3000_s18  ;;  %p157_p4 = scmp.eq.s32.totalorder %s2536_s23, 2 }
   0x8   : > { %s3085_s27 = scalar_select %p138_p1, %s3008_s20, %s140_s25  }
   0x9   : > { %p3087_p5 = por %p151_p2, %p150_p0  ;;  %p3091_p6 = por %p157_p4, %p156_p3 }
   0xa   : > { %p2539_p7 = scmp.ge.s32.totalorder %s3012_s21, 1  ;;  %p217_p8 = scmp.lt.s32.totalorder %s3012_s21, 4 }
   0xc   : > { %p218_p9 = pnand %p2539_p7, %p217_p8 }
   0xe   : > { %221 = sbr.rel (%p218_p9) target bundleno = 951 (0x3b7), region = 40 }
  0x13   : > { %v3100_v0 = vld [vmem:[%s3803_s2] sm:$0xff]  ;;  %v3105_v1 = vld [vmem:[%s3803_s2 + $0x10] sm:$0xff]  ;;  %s3108_s9 = sshll.u32 %s3070_s22, 3  ;;  %v422_v2 = vlaneseq  ;;  %s3014_s10 = smov 120   ;;  %v3116_v3 = vld [vmem:[%s3803_s2 + $0x8] sm:$0xff]  ;;  %v3808_v6 = vmov 0.0  }
  0x14   : > { %493 = vrot.lane.b32.xlu0 %v3100_v0, %s3014_s10  ;;  %497 = vrot.lane.b32.xlu1 %v3105_v1, %s3014_s10  ;;  %p262_p10 = scmp.lt.s32.totalorder %s3108_s9, 16  ;;  %v3121_v4 = vld [vmem:[%s3803_s2 + $0x18] sm:$0xff]  ;;  %vm510_vm1 = vcmask 1044480   ;;  %s3183_s25 = sshll.u32 %s3070_s22, 7  ;;  %vm501_vm10 = vcmask 39936   ;;  %vm891_vm11 = vcmask 64512  }
  0x15   : > { %v3123_v5 = vshrl.u32 %v422_v2, 7  ;;  %599 = vmatprep.mubr.f32.mxu0 %v3808_v6  ;;  %688 = vmatprep.mubr.f32.mxu1 %v3808_v6  ;;  %p275_p11 = scmp.lt.s32.totalorder %s3183_s25, 256  ;;  %vm1696_vm12 = vcmask 261120  }
  0x16   : > { %s263_s15 = scalar_select %p262_p10, %s3108_s9, 16 }
  0x17   : > { %3816 = vst [vmem:[#allocation5_spill] sm:$0xff] %v3123_v5  ;;  %v431_v7 = vsub.s32 1, %v3123_v5  ;;  %v439_v8 = vsub.s32 3, %v3123_v5  ;;  %v3807_v9 = vsub.s32 0, %v3123_v5  ;;  %v435_v10 = vsub.s32 2, %v3123_v5  ;;  %s276_s26 = scalar_select %p275_p11, %s3183_s25, 256 }
  0x18   : > { %495 = vrot.lane.b32.xlu0 %v3116_v3, %s3014_s10  ;;  %499 = vrot.lane.b32.xlu1 %v3121_v4, %s3014_s10  ;;  %s264_s23 = scalar_lea.vmem %s3801_s0, %s263_s15  ;;  %v447_v11 = vsub.s32 5, %v3123_v5  ;;  %v455_v12 = vsub.s32 7, %v3123_v5  ;;  %v443_v13 = vsub.s32 4, %v3123_v5  ;;  %vm424_vm0 = vcmp.lt.s32.totalorder %v3123_v5, 4 }
  0x19   : > { %v417_v14 = vld [vmem:[%s264_s23] sm:$0xff]  ;;  %v451_v15 = vsub.s32 6, %v3123_v5  ;;  %s2543_s30 = sshll.u32 %s276_s26, 3  ;;  %s254_s26 = sand.u32 1, %s3004_s19  }
  0x1a   : > { %v432_v16 = vrot.slane %v417_v14, %v431_v7  ;;  %v440_v17 = vrot.slane %v417_v14, %v439_v8  ;;  %v428_v18 = vrot.slane %v417_v14, %v3807_v9  ;;  %v436_v19 = vrot.slane %v417_v14, %v435_v10  ;;  %s3190_s8 = scalar_lea.vmem %s3802_s1, %s2543_s30  ;;  %s2540_s30 = sshll.u32 %s254_s26, 3 }
  0x1b   : > { %v448_v20 = vrot.slane %v417_v14, %v447_v11  ;;  %v456_v21 = vrot.slane %v417_v14, %v455_v12  ;;  %v444_v22 = vrot.slane %v417_v14, %v443_v13  ;;  %v452_v23 = vrot.slane %v417_v14, %v451_v15  ;;  %v320_v41 = vld [vmem:[%s3190_s8 + $0xf8] sm:$0xff]  ;;  %v319_v48 = vld [vmem:[%s3190_s8 + $0xf0] sm:$0xff]  ;;  %v318_v52 = vld [vmem:[%s3190_s8 + $0xe8] sm:$0xff]  ;;  %s256_s6 = scalar_lea.vmem [#allocation2], %s2540_s30  ;;  %s3754_s7 = scalar_lea.sflag [#allocation3], %s254_s26 }
  0x1c   : > { %vm458_vm2 = vcmp.eq.s32.totalorder %v432_v16, %v3123_v5  ;;  %vm460_vm3 = vcmp.eq.s32.totalorder %v440_v17, %v3123_v5  ;;  %vm457_vm4 = vcmp.eq.s32.totalorder %v428_v18, %v3123_v5  ;;  %vm459_vm5 = vcmp.eq.s32.totalorder %v436_v19, %v3123_v5  ;;  %v352_v42 = vld [vmem:[%s3190_s8 + $0x1f8] sm:$0xff]  ;;  %v351_v49 = vld [vmem:[%s3190_s8 + $0x1f0] sm:$0xff]  ;;  %v350_v53 = vld [vmem:[%s3190_s8 + $0x1e8] sm:$0xff] }
  0x1d   : > { %v2545_v24 = vsel %vm458_vm2, 1.0, %v3808_v6  ;;  %v2547_v25 = vsel %vm460_vm3, 1.0, %v3808_v6  ;;  %v2544_v26 = vsel %vm457_vm4, 1.0, %v3808_v6  ;;  %v2546_v27 = vsel %vm459_vm5, 1.0, %v3808_v6  ;;  %v304_v46 = vld [vmem:[%s3190_s8 + $0x78] sm:$0xff]  ;;  %v303_v50 = vld [vmem:[%s3190_s8 + $0x70] sm:$0xff] }
  0x1e   : > { %v482_v28 = vsel %vm424_vm0, %v2545_v24, 1.0  ;;  %v484_v29 = vsel %vm424_vm0, %v2547_v25, 1.0  ;;  %v481_v30 = vsel %vm424_vm0, %v2544_v26, 1.0  ;;  %v483_v31 = vsel %vm424_vm0, %v2546_v27, 1.0  ;;  %v336_v47 = vld [vmem:[%s3190_s8 + $0x178] sm:$0xff]  ;;  %v335_v51 = vld [vmem:[%s3190_s8 + $0x170] sm:$0xff] }
  0x1f   : > { %2552 = vmatprep.subr.msk.mxu0 %vm510_vm1, %v482_v28  ;;  %2558 = vmatprep.subr.msk.mxu1 %vm510_vm1, %v484_v29  ;;  %vm462_vm6 = vcmp.eq.s32.totalorder %v448_v20, %v3123_v5  ;;  %vm464_vm7 = vcmp.eq.s32.totalorder %v456_v21, %v3123_v5  ;;  %vm461_vm8 = vcmp.eq.s32.totalorder %v444_v22, %v3123_v5  ;;  %v302_v54 = vld [vmem:[%s3190_s8 + $0x68] sm:$0xff]  ;;  %v317_v56 = vld [vmem:[%s3190_s8 + $0xe0] sm:$0xff]  ;;  %v316_v60 = vld [vmem:[%s3190_s8 + $0xd8] sm:$0xff] }
  0x20   : > { %2553 = vmatpush1.msk.msra.mxu0 %vm510_vm1, %v481_v30  ;;  %2559 = vmatpush1.msk.msra.mxu1 %vm510_vm1, %v483_v31  ;;  %v2549_v32 = vsel %vm462_vm6, 1.0, %v3808_v6  ;;  %v2551_v33 = vsel %vm464_vm7, 1.0, %v3808_v6  ;;  %v2548_v34 = vsel %vm461_vm8, 1.0, %v3808_v6  ;;  %vm463_vm9 = vcmp.eq.s32.totalorder %v452_v23, %v3123_v5  ;;  %v334_v55 = vld [vmem:[%s3190_s8 + $0x168] sm:$0xff]  ;;  %v349_v57 = vld [vmem:[%s3190_s8 + $0x1e0] sm:$0xff]  ;;  %v348_v61 = vld [vmem:[%s3190_s8 + $0x1d8] sm:$0xff] }
  0x21   : > { %v486_v35 = vsel %vm424_vm0, %v2549_v32, 1.0  ;;  %v488_v36 = vsel %vm424_vm0, %v2551_v33, 1.0  ;;  %v485_v37 = vsel %vm424_vm0, %v2548_v34, 1.0  ;;  %v2550_v38 = vsel %vm463_vm9, 1.0, %v3808_v6  ;;  %v301_v58 = vld [vmem:[%s3190_s8 + $0x60] sm:$0xff]  ;;  %v300_v62 = vld [vmem:[%s3190_s8 + $0x58] sm:$0xff] }
  0x22   : > { %2564 = vmatprep.subr.msk.mxu0 %vm510_vm1, %v486_v35  ;;  %2570 = vmatprep.subr.msk.mxu1 %vm510_vm1, %v488_v36  ;;  %v487_v39 = vsel %vm424_vm0, %v2550_v38, 1.0  ;;  %v333_v59 = vld [vmem:[%s3190_s8 + $0x160] sm:$0xff]  ;;  %v332_v63 = vld [vmem:[%s3190_s8 + $0x158] sm:$0xff]  ;;  %v315_v2 = vld [vmem:[%s3190_s8 + $0xd0] sm:$0xff] }
  0x23   : > { %v347_v7 = vld [vmem:[%s3190_s8 + $0x1d0] sm:$0xff]  ;;  %v314_v11 = vld [vmem:[%s3190_s8 + $0xc8] sm:$0xff]  ;;  %v313_v15 = vld [vmem:[%s3190_s8 + $0xc0] sm:$0xff] }
  0x24   : > { %v299_v8 = vld [vmem:[%s3190_s8 + $0x50] sm:$0xff]  ;;  %v346_v12 = vld [vmem:[%s3190_s8 + $0x1c8] sm:$0xff]  ;;  %v345_v16 = vld [vmem:[%s3190_s8 + $0x1c0] sm:$0xff] }
  0x25   : > { %v331_v10 = vld [vmem:[%s3190_s8 + $0x150] sm:$0xff]  ;;  %v298_v13 = vld [vmem:[%s3190_s8 + $0x48] sm:$0xff]  ;;  %v297_v17 = vld [vmem:[%s3190_s8 + $0x40] sm:$0xff] }
  0x26   : > { %v330_v14 = vld [vmem:[%s3190_s8 + $0x148] sm:$0xff]  ;;  %v329_v18 = vld [vmem:[%s3190_s8 + $0x140] sm:$0xff]  ;;  %v312_v19 = vld [vmem:[%s3190_s8 + $0xb8] sm:$0xff] }
  0x27   : > { %v344_v20 = vld [vmem:[%s3190_s8 + $0x1b8] sm:$0xff]  ;;  %v311_v23 = vld [vmem:[%s3190_s8 + $0xb0] sm:$0xff]  ;;  %v310_v27 = vld [vmem:[%s3190_s8 + $0xa8] sm:$0xff] }
  0x28   : > { %v296_v21 = vld [vmem:[%s3190_s8 + $0x38] sm:$0xff]  ;;  %v343_v24 = vld [vmem:[%s3190_s8 + $0x1b0] sm:$0xff]  ;;  %v342_v28 = vld [vmem:[%s3190_s8 + $0x1a8] sm:$0xff] }
  0x29   : > { %v328_v22 = vld [vmem:[%s3190_s8 + $0x138] sm:$0xff]  ;;  %v295_v25 = vld [vmem:[%s3190_s8 + $0x30] sm:$0xff]  ;;  %v294_v29 = vld [vmem:[%s3190_s8 + $0x28] sm:$0xff] }
  0x2a   : > { %v327_v26 = vld [vmem:[%s3190_s8 + $0x130] sm:$0xff]  ;;  %v326_v30 = vld [vmem:[%s3190_s8 + $0x128] sm:$0xff]  ;;  %v309_v31 = vld [vmem:[%s3190_s8 + $0xa0] sm:$0xff] }
  0x2b   : > { %v341_v32 = vld [vmem:[%s3190_s8 + $0x1a0] sm:$0xff]  ;;  %v308_v35 = vld [vmem:[%s3190_s8 + $0x98] sm:$0xff] }
  0x2c   : > { %v293_v33 = vld [vmem:[%s3190_s8 + $0x20] sm:$0xff]  ;;  %v340_v36 = vld [vmem:[%s3190_s8 + $0x198] sm:$0xff] }
  0x2d   : > { %v325_v34 = vld [vmem:[%s3190_s8 + $0x120] sm:$0xff]  ;;  %v324_v38 = vld [vmem:[%s3190_s8 + $0x118] sm:$0xff] }
  0x86   : > { %v494_v40 = vpop.permute.xlu0 %493  ;;  %v498_v44 = vpop.permute.xlu1 %497 }
  0x87   : > { %2554 = vmatmul.mubr.msk.f32.vlgmr.msra.gmra.mxu0 %vm501_vm10, %v494_v40  ;;  %2560 = vmatmul.mubr.msk.f32.vlgmr.msra.gmra.mxu1 %vm501_vm10, %v494_v40 }
  0x88   : > { %605 = vmatprep.mubr.f32.mxu0 %v3808_v6  ;;  %694 = vmatprep.mubr.f32.mxu1 %v3808_v6 }
  0x89   : > { %2565 = vmatpush1.msk.msra.mxu0 %vm510_vm1, %v485_v37  ;;  %2571 = vmatpush1.msk.msra.mxu1 %vm510_vm1, %v487_v39  ;;  %v292_v37 = vld [vmem:[%s3190_s8 + $0x18] sm:$0xff]  ;;  %v307_v39 = vld [vmem:[%s3190_s8 + $0x90] sm:$0xff] }
  0x8a   : > { %v496_v43 = vpop.permute.xlu0 %495  ;;  %2748 = vmatprep.subr.msk.mxu0 %vm891_vm11, %v320_v41  ;;  %2788 = vmatprep.subr.msk.mxu1 %vm891_vm11, %v352_v42  ;;  %v500_v45 = vpop.permute.xlu1 %499  ;;  %v291_v41 = vld [vmem:[%s3190_s8 + $0x10] sm:$0xff] }
  0x8b   : > { %2555 = vmatmul.mubr.msk.f32.gmra.mxu0 %vm501_vm10, %v496_v43  ;;  %2561 = vmatmul.mubr.msk.f32.gmra.mxu1 %vm501_vm10, %v496_v43  ;;  %v323_v42 = vld [vmem:[%s3190_s8 + $0x110] sm:$0xff] }
  0x8c   : > { %611 = vmatprep.mubr.f32.mxu0 %v3808_v6  ;;  %700 = vmatprep.mubr.f32.mxu1 %v3808_v6 }
  0x8f   : > { %2556 = vmatmul.mubr.msk.f32.gmra.mxu0 %vm501_vm10, %v498_v44  ;;  %2562 = vmatmul.mubr.msk.f32.gmra.mxu1 %vm501_vm10, %v498_v44 }
  0x90   : > { %617 = vmatprep.mubr.f32.mxu0 %v3808_v6  ;;  %706 = vmatprep.mubr.f32.mxu1 %v3808_v6 }
  0x93   : > { %2557 = vmatmul.mubr.msk.f32.gmra.mxu0 %vm501_vm10, %v500_v45  ;;  %2563 = vmatmul.mubr.msk.f32.gmra.mxu1 %vm501_vm10, %v500_v45 }
  0x94   : > { %777 = vmatprep.mubr.f32.mxu0 %v3808_v6  ;;  %866 = vmatprep.mubr.f32.mxu1 %v3808_v6 }
  0x97   : > { %2566 = vmatmul.mubr.msk.f32.vlgmr.msra.gmra.mxu0 %vm501_vm10, %v494_v40  ;;  %2572 = vmatmul.mubr.msk.f32.vlgmr.msra.gmra.mxu1 %vm501_vm10, %v494_v40  ;;  %v339_v40 = vld [vmem:[%s3190_s8 + $0x190] sm:$0xff] }
  0x98   : > { %2749 = vmatpush3.xpose.msk.msra.mxu0 %vm891_vm11, %v304_v46  ;;  %2789 = vmatpush3.xpose.msk.msra.mxu1 %vm891_vm11, %v336_v47  ;;  %v322_v46 = vld [vmem:[%s3190_s8 + $0x108] sm:$0xff]  ;;  %v305_v47 = vld [vmem:[%s3190_s8 + $0x80] sm:$0xff] }
  0x99   : > { %783 = vmatprep.mubr.f32.mxu0 %v3808_v6  ;;  %872 = vmatprep.mubr.f32.mxu1 %v3808_v6 }
  0x9a   : > { %2750 = vmatprep.subr.msk.mxu0 %vm891_vm11, %v319_v48  ;;  %2790 = vmatprep.subr.msk.mxu1 %vm891_vm11, %v351_v49  ;;  %v337_v48 = vld [vmem:[%s3190_s8 + $0x180] sm:$0xff] }
  0x9b   : > { %2567 = vmatmul.mubr.msk.f32.gmra.mxu0 %vm501_vm10, %v496_v43  ;;  %2573 = vmatmul.mubr.msk.f32.gmra.mxu1 %vm501_vm10, %v496_v43  ;;  %v306_v43 = vld [vmem:[%s3190_s8 + $0x88] sm:$0xff]  ;;  %v289_v49 = vld [vmem:[%s3190_s8] sm:$0xff] }
  0x9c   : > { %2751 = vmatpush3.xpose.msk.msra.mxu0 %vm891_vm11, %v303_v50  ;;  %2791 = vmatpush3.xpose.msk.msra.mxu1 %vm891_vm11, %v335_v51  ;;  %v321_v50 = vld [vmem:[%s3190_s8 + $0x100] sm:$0xff]  ;;  %v384_v51 = vld [vmem:[%s3190_s8 + $0x2f8] sm:$0xff] }
  0x9d   : > { %789 = vmatprep.mubr.f32.mxu0 %v3808_v6  ;;  %878 = vmatprep.mubr.f32.mxu1 %v3808_v6 }
  0x9e   : > { %2752 = vmatprep.subr.msk.mxu0 %vm891_vm11, %v318_v52  ;;  %2792 = vmatprep.subr.msk.mxu1 %vm891_vm11, %v350_v53  ;;  %v416_v52 = vld [vmem:[%s3190_s8 + $0x3f8] sm:$0xff] }
  0x9f   : > { %2568 = vmatmul.mubr.msk.f32.gmra.mxu0 %vm501_vm10, %v498_v44  ;;  %2574 = vmatmul.mubr.msk.f32.gmra.mxu1 %vm501_vm10, %v498_v44  ;;  %v338_v44 = vld [vmem:[%s3190_s8 + $0x188] sm:$0xff]  ;;  %v368_v53 = vld [vmem:[%s3190_s8 + $0x278] sm:$0xff] }
  0xa0   : > { %2753 = vmatpush3.xpose.msk.msra.mxu0 %vm891_vm11, %v302_v54  ;;  %2793 = vmatpush3.xpose.msk.msra.mxu1 %vm891_vm11, %v334_v55  ;;  %v400_v54 = vld [vmem:[%s3190_s8 + $0x378] sm:$0xff]  ;;  %v383_v55 = vld [vmem:[%s3190_s8 + $0x2f0] sm:$0xff] }
  0xa1   : > { %795 = vmatprep.mubr.f32.mxu0 %v3808_v6  ;;  %884 = vmatprep.mubr.f32.mxu1 %v3808_v6 }
  0xa2   : > { %2754 = vmatprep.subr.msk.mxu0 %vm891_vm11, %v317_v56  ;;  %2794 = vmatprep.subr.msk.mxu1 %vm891_vm11, %v349_v57  ;;  %v415_v56 = vld [vmem:[%s3190_s8 + $0x3f0] sm:$0xff] }
  0xa3   : > { %2569 = vmatmul.mubr.msk.f32.gmra.mxu0 %vm501_vm10, %v500_v45  ;;  %2575 = vmatmul.mubr.msk.f32.gmra.mxu1 %vm501_vm10, %v500_v45  ;;  %v290_v45 = vld [vmem:[%s3190_s8 + $0x8] sm:$0xff]  ;;  %v367_v57 = vld [vmem:[%s3190_s8 + $0x270] sm:$0xff] }
  0xa4   : > { %2755 = vmatpush3.xpose.msk.msra.mxu0 %vm891_vm11, %v301_v58  ;;  %2795 = vmatpush3.xpose.msk.msra.mxu1 %vm891_vm11, %v333_v59  ;;  %v399_v58 = vld [vmem:[%s3190_s8 + $0x370] sm:$0xff]  ;;  %v382_v59 = vld [vmem:[%s3190_s8 + $0x2e8] sm:$0xff] }
  0xa5   : > { %2756 = vmatprep.subr.msk.mxu0 %vm891_vm11, %v316_v60  ;;  %2796 = vmatprep.subr.msk.mxu1 %vm891_vm11, %v348_v61  ;;  %v414_v60 = vld [vmem:[%s3190_s8 + $0x3e8] sm:$0xff] }
  0xa6   : > { %2780 = vmatprep.mubr.msk.f32.mxu0 %vm891_vm11, %v3100_v0  ;;  %2820 = vmatprep.mubr.msk.f32.mxu1 %vm891_vm11, %v3100_v0  ;;  %v366_v61 = vld [vmem:[%s3190_s8 + $0x268] sm:$0xff] }
  0xa8   : > { %2757 = vmatpush3.xpose.msk.msra.mxu0 %vm891_vm11, %v300_v62  ;;  %2797 = vmatpush3.xpose.msk.msra.mxu1 %vm891_vm11, %v332_v63  ;;  %v398_v62 = vld [vmem:[%s3190_s8 + $0x368] sm:$0xff]  ;;  %v381_v63 = vld [vmem:[%s3190_s8 + $0x2e0] sm:$0xff] }
  0xa9   : > { %2758 = vmatprep.subr.msk.mxu0 %vm891_vm11, %v315_v2  ;;  %2798 = vmatprep.subr.msk.mxu1 %vm891_vm11, %v347_v7  ;;  %v413_v2 = vld [vmem:[%s3190_s8 + $0x3e0] sm:$0xff] }
  0xaa   : > { %v365_v7 = vld [vmem:[%s3190_s8 + $0x260] sm:$0xff] }
  0xac   : > { %2759 = vmatpush3.xpose.msk.msra.mxu0 %vm891_vm11, %v299_v8  ;;  %2799 = vmatpush3.xpose.msk.msra.mxu1 %vm891_vm11, %v331_v10  ;;  %v397_v8 = vld [vmem:[%s3190_s8 + $0x360] sm:$0xff]  ;;  %v380_v10 = vld [vmem:[%s3190_s8 + $0x2d8] sm:$0xff] }
  0xad   : > { %2760 = vmatprep.subr.msk.mxu0 %vm891_vm11, %v314_v11  ;;  %2800 = vmatprep.subr.msk.mxu1 %vm891_vm11, %v346_v12  ;;  %v412_v11 = vld [vmem:[%s3190_s8 + $0x3d8] sm:$0xff] }
  0xae   : > { %v364_v12 = vld [vmem:[%s3190_s8 + $0x258] sm:$0xff] }
  0xb0   : > { %2761 = vmatpush3.xpose.msk.msra.mxu0 %vm891_vm11, %v298_v13  ;;  %2801 = vmatpush3.xpose.msk.msra.mxu1 %vm891_vm11, %v330_v14  ;;  %v396_v13 = vld [vmem:[%s3190_s8 + $0x358] sm:$0xff]  ;;  %v379_v14 = vld [vmem:[%s3190_s8 + $0x2d0] sm:$0xff] }
  0xb1   : > { %2762 = vmatprep.subr.msk.mxu0 %vm891_vm11, %v313_v15  ;;  %2802 = vmatprep.subr.msk.mxu1 %vm891_vm11, %v345_v16  ;;  %v411_v15 = vld [vmem:[%s3190_s8 + $0x3d0] sm:$0xff] }
  0xb2   : > { %v363_v16 = vld [vmem:[%s3190_s8 + $0x250] sm:$0xff] }
  0xb4   : > { %2763 = vmatpush3.xpose.msk.msra.mxu0 %vm891_vm11, %v297_v17  ;;  %2803 = vmatpush3.xpose.msk.msra.mxu1 %vm891_vm11, %v329_v18  ;;  %v395_v17 = vld [vmem:[%s3190_s8 + $0x350] sm:$0xff]  ;;  %v378_v18 = vld [vmem:[%s3190_s8 + $0x2c8] sm:$0xff] }
  0xb5   : > { %2764 = vmatprep.subr.msk.mxu0 %vm891_vm11, %v312_v19  ;;  %2804 = vmatprep.subr.msk.mxu1 %vm891_vm11, %v344_v20  ;;  %v410_v19 = vld [vmem:[%s3190_s8 + $0x3c8] sm:$0xff] }
  0xb6   : > { %v362_v20 = vld [vmem:[%s3190_s8 + $0x248] sm:$0xff] }
  0xb8   : > { %2765 = vmatpush3.xpose.msk.msra.mxu0 %vm891_vm11, %v296_v21  ;;  %2805 = vmatpush3.xpose.msk.msra.mxu1 %vm891_vm11, %v328_v22  ;;  %v394_v21 = vld [vmem:[%s3190_s8 + $0x348] sm:$0xff]  ;;  %v377_v22 = vld [vmem:[%s3190_s8 + $0x2c0] sm:$0xff] }
  0xb9   : > { %2766 = vmatprep.subr.msk.mxu0 %vm891_vm11, %v311_v23  ;;  %2806 = vmatprep.subr.msk.mxu1 %vm891_vm11, %v343_v24  ;;  %v409_v23 = vld [vmem:[%s3190_s8 + $0x3c0] sm:$0xff] }
  0xba   : > { %v361_v24 = vld [vmem:[%s3190_s8 + $0x240] sm:$0xff] }
  0xbc   : > { %2767 = vmatpush3.xpose.msk.msra.mxu0 %vm891_vm11, %v295_v25  ;;  %2807 = vmatpush3.xpose.msk.msra.mxu1 %vm891_vm11, %v327_v26  ;;  %v393_v25 = vld [vmem:[%s3190_s8 + $0x340] sm:$0xff]  ;;  %v376_v26 = vld [vmem:[%s3190_s8 + $0x2b8] sm:$0xff] }
  0xbd   : > { %2768 = vmatprep.subr.msk.mxu0 %vm891_vm11, %v310_v27  ;;  %2808 = vmatprep.subr.msk.mxu1 %vm891_vm11, %v342_v28  ;;  %v408_v27 = vld [vmem:[%s3190_s8 + $0x3b8] sm:$0xff] }
  0xbe   : > { %v360_v28 = vld [vmem:[%s3190_s8 + $0x238] sm:$0xff] }
  0xc0   : > { %2769 = vmatpush3.xpose.msk.msra.mxu0 %vm891_vm11, %v294_v29  ;;  %2809 = vmatpush3.xpose.msk.msra.mxu1 %vm891_vm11, %v326_v30  ;;  %v392_v29 = vld [vmem:[%s3190_s8 + $0x338] sm:$0xff]  ;;  %v375_v30 = vld [vmem:[%s3190_s8 + $0x2b0] sm:$0xff] }
  0xc1   : > { %2770 = vmatprep.subr.msk.mxu0 %vm891_vm11, %v309_v31  ;;  %2810 = vmatprep.subr.msk.mxu1 %vm891_vm11, %v341_v32  ;;  %v407_v31 = vld [vmem:[%s3190_s8 + $0x3b0] sm:$0xff] }
  0xc2   : > { %v359_v32 = vld [vmem:[%s3190_s8 + $0x230] sm:$0xff] }
  0xc4   : > { %2771 = vmatpush3.xpose.msk.msra.mxu0 %vm891_vm11, %v293_v33  ;;  %2811 = vmatpush3.xpose.msk.msra.mxu1 %vm891_vm11, %v325_v34  ;;  %v391_v33 = vld [vmem:[%s3190_s8 + $0x330] sm:$0xff]  ;;  %v374_v34 = vld [vmem:[%s3190_s8 + $0x2a8] sm:$0xff] }
  0xc5   : > { %2772 = vmatprep.subr.msk.mxu0 %vm891_vm11, %v308_v35  ;;  %2812 = vmatprep.subr.msk.mxu1 %vm891_vm11, %v340_v36  ;;  %v406_v35 = vld [vmem:[%s3190_s8 + $0x3a8] sm:$0xff] }
  0xc6   : > { %v358_v36 = vld [vmem:[%s3190_s8 + $0x228] sm:$0xff] }
  0xc8   : > { %2773 = vmatpush3.xpose.msk.msra.mxu0 %vm891_vm11, %v292_v37  ;;  %2813 = vmatpush3.xpose.msk.msra.mxu1 %vm891_vm11, %v324_v38  ;;  %v390_v37 = vld [vmem:[%s3190_s8 + $0x328] sm:$0xff]  ;;  %v373_v38 = vld [vmem:[%s3190_s8 + $0x2a0] sm:$0xff] }
  0xc9   : > { %2774 = vmatprep.subr.msk.mxu0 %vm891_vm11, %v307_v39  ;;  %2814 = vmatprep.subr.msk.mxu1 %vm891_vm11, %v339_v40  ;;  %v405_v39 = vld [vmem:[%s3190_s8 + $0x3a0] sm:$0xff] }
  0xca   : > { %v357_v40 = vld [vmem:[%s3190_s8 + $0x220] sm:$0xff] }
  0xcc   : > { %2775 = vmatpush3.xpose.msk.msra.mxu0 %vm891_vm11, %v291_v41  ;;  %2815 = vmatpush3.xpose.msk.msra.mxu1 %vm891_vm11, %v323_v42  ;;  %v389_v41 = vld [vmem:[%s3190_s8 + $0x320] sm:$0xff]  ;;  %v372_v42 = vld [vmem:[%s3190_s8 + $0x298] sm:$0xff] }
  0xcd   : > { %2776 = vmatprep.subr.msk.mxu0 %vm891_vm11, %v306_v43  ;;  %2816 = vmatprep.subr.msk.mxu1 %vm891_vm11, %v338_v44  ;;  %v404_v43 = vld [vmem:[%s3190_s8 + $0x398] sm:$0xff] }
  0xce   : > { %v356_v44 = vld [vmem:[%s3190_s8 + $0x218] sm:$0xff] }
  0xd0   : > { %2777 = vmatpush3.xpose.msk.msra.mxu0 %vm891_vm11, %v290_v45  ;;  %2817 = vmatpush3.xpose.msk.msra.mxu1 %vm891_vm11, %v322_v46  ;;  %v388_v45 = vld [vmem:[%s3190_s8 + $0x318] sm:$0xff]  ;;  %v371_v46 = vld [vmem:[%s3190_s8 + $0x290] sm:$0xff] }
  0xd1   : > { %2778 = vmatprep.subr.msk.mxu0 %vm891_vm11, %v305_v47  ;;  %2818 = vmatprep.subr.msk.mxu1 %vm891_vm11, %v337_v48  ;;  %v403_v47 = vld [vmem:[%s3190_s8 + $0x390] sm:$0xff] }
  0xd2   : > { %v355_v48 = vld [vmem:[%s3190_s8 + $0x210] sm:$0xff] }
  0xd4   : > { %2779 = vmatpush3.xpose.msk.msra.mxu0 %vm891_vm11, %v289_v49  ;;  %2819 = vmatpush3.xpose.msk.msra.mxu1 %vm891_vm11, %v321_v50  ;;  %v387_v49 = vld [vmem:[%s3190_s8 + $0x310] sm:$0xff]  ;;  %v370_v50 = vld [vmem:[%s3190_s8 + $0x288] sm:$0xff] }
  0xd5   : > { %2828 = vmatprep.subr.msk.mxu0 %vm891_vm11, %v384_v51  ;;  %2868 = vmatprep.subr.msk.mxu1 %vm891_vm11, %v416_v52  ;;  %v402_v51 = vld [vmem:[%s3190_s8 + $0x388] sm:$0xff] }
  0xd6   : > { %v354_v52 = vld [vmem:[%s3190_s8 + $0x208] sm:$0xff] }
  0xd7   : > { %2781 = vmatmul.mubr.msk.f32.vlgmr.msra.gmra.mxu0 %vm891_vm11, %v3100_v0  ;;  %2821 = vmatmul.mubr.msk.f32.vlgmr.msra.gmra.mxu1 %vm891_vm11, %v3100_v0 }
  0xd8   : > { %2829 = vmatpush3.xpose.msk.msra.mxu0 %vm891_vm11, %v368_v53  ;;  %2869 = vmatpush3.xpose.msk.msra.mxu1 %vm891_vm11, %v400_v54  ;;  %v386_v53 = vld [vmem:[%s3190_s8 + $0x308] sm:$0xff]  ;;  %v369_v54 = vld [vmem:[%s3190_s8 + $0x280] sm:$0xff] }
  0xd9   : > { %2782 = vmatprep.mubr.msk.f32.mxu0 %vm891_vm11, %v3116_v3  ;;  %2822 = vmatprep.mubr.msk.f32.mxu1 %vm891_vm11, %v3116_v3 }
  0xda   : > { %2830 = vmatprep.subr.msk.mxu0 %vm891_vm11, %v383_v55  ;;  %2870 = vmatprep.subr.msk.mxu1 %vm891_vm11, %v415_v56  ;;  %v401_v55 = vld [vmem:[%s3190_s8 + $0x380] sm:$0xff] }
  0xdb   : > { %2783 = vmatmul.mubr.msk.f32.gmra.mxu0 %vm891_vm11, %v3116_v3  ;;  %2823 = vmatmul.mubr.msk.f32.gmra.mxu1 %vm891_vm11, %v3116_v3  ;;  %v353_v56 = vld [vmem:[%s3190_s8 + $0x200] sm:$0xff] }
  0xdc   : > { %2831 = vmatpush3.xpose.msk.msra.mxu0 %vm891_vm11, %v367_v57  ;;  %2871 = vmatpush3.xpose.msk.msra.mxu1 %vm891_vm11, %v399_v58  ;;  %v385_v57 = vld [vmem:[%s3190_s8 + $0x300] sm:$0xff]  ;;  %s2457_s8 = ssub.s32 (%p3087_p5), 17, %s3108_s9 }
  0xdd   : > { %2784 = vmatprep.mubr.msk.f32.mxu0 %vm891_vm11, %v3105_v1  ;;  %2824 = vmatprep.mubr.msk.f32.mxu1 %vm891_vm11, %v3105_v1  ;;  %p2458_p12 = scmp.lt.s32.totalorder (%p3087_p5), %s2457_s8, 8 }
  0xde   : > { %2832 = vmatprep.subr.msk.mxu0 %vm891_vm11, %v382_v59  ;;  %2872 = vmatprep.subr.msk.mxu1 %vm891_vm11, %v414_v60 }
  0xdf   : > { %2785 = vmatmul.mubr.msk.f32.gmra.mxu0 %vm891_vm11, %v3105_v1  ;;  %2825 = vmatmul.mubr.msk.f32.gmra.mxu1 %vm891_vm11, %v3105_v1 }
  0xe0   : > { %2833 = vmatpush3.xpose.msk.msra.mxu0 %vm891_vm11, %v366_v61  ;;  %2873 = vmatpush3.xpose.msk.msra.mxu1 %vm891_vm11, %v398_v62 }
  0xe1   : > { %2786 = vmatprep.mubr.msk.f32.mxu0 %vm891_vm11, %v3121_v4  ;;  %2826 = vmatprep.mubr.msk.f32.mxu1 %vm891_vm11, %v3121_v4 }
  0xe2   : > { %2834 = vmatprep.subr.msk.mxu0 %vm891_vm11, %v381_v63  ;;  %2874 = vmatprep.subr.msk.mxu1 %vm891_vm11, %v413_v2 }
  0xe3   : > { %2787 = vmatmul.mubr.msk.f32.gmra.mxu0 %vm891_vm11, %v3121_v4  ;;  %2827 = vmatmul.mubr.msk.f32.gmra.mxu1 %vm891_vm11, %v3121_v4 }
  0xe4   : > { %2835 = vmatpush3.xpose.msk.msra.mxu0 %vm891_vm11, %v365_v7  ;;  %2875 = vmatpush3.xpose.msk.msra.mxu1 %vm891_vm11, %v397_v8 }
  0xe5   : > { %2836 = vmatprep.subr.msk.mxu0 %vm891_vm11, %v380_v10  ;;  %2876 = vmatprep.subr.msk.mxu1 %vm891_vm11, %v412_v11 }
  0xe6   : > { %2860 = vmatprep.mubr.msk.f32.mxu0 %vm891_vm11, %v3100_v0  ;;  %2900 = vmatprep.mubr.msk.f32.mxu1 %vm891_vm11, %v3100_v0 }
  0xe8   : > { %2837 = vmatpush3.xpose.msk.msra.mxu0 %vm891_vm11, %v364_v12  ;;  %2877 = vmatpush3.xpose.msk.msra.mxu1 %vm891_vm11, %v396_v13 }
  0xe9   : > { %2838 = vmatprep.subr.msk.mxu0 %vm891_vm11, %v379_v14  ;;  %2878 = vmatprep.subr.msk.mxu1 %vm891_vm11, %v411_v15 }
  0xec   : > { %2839 = vmatpush3.xpose.msk.msra.mxu0 %vm891_vm11, %v363_v16  ;;  %2879 = vmatpush3.xpose.msk.msra.mxu1 %vm891_vm11, %v395_v17  ;;  %v3573_v17 = vld [vmem:[%s3804_s3 + $0x10] sm:$0xff] }
  0xed   : > { %2840 = vmatprep.subr.msk.mxu0 %vm891_vm11, %v378_v18  ;;  %2880 = vmatprep.subr.msk.mxu1 %vm891_vm11, %v410_v19  ;;  %v3578_v18 = vld [vmem:[%s3804_s3 + $0x18] sm:$0xff]  ;;  %v3016_v19 = vmov 32  }
  0xee   : > { %2951 = vset.pattern.permute.xlu1 %v3016_v19  ;;  %2950 = vset.pattern.permute.xlu0 %v3016_v19 }
  0xef   : > { %1688 = vperm.xlu1 %2951, %v3573_v17   ;;  %1693 = vperm.xlu0 %2950, %v3578_v18  }
  0xf0   : > { %2841 = vmatpush3.xpose.msk.msra.mxu0 %vm891_vm11, %v362_v20  ;;  %2881 = vmatpush3.xpose.msk.msra.mxu1 %vm891_vm11, %v394_v21 }
  0xf1   : > { %2842 = vmatprep.subr.msk.mxu0 %vm891_vm11, %v377_v22  ;;  %2882 = vmatprep.subr.msk.mxu1 %vm891_vm11, %v409_v23  ;;  %v3589_v22 = vld [vmem:[%s3804_s3] sm:$0xff]  ;;  %v3594_v23 = vld [vmem:[%s3804_s3 + $0x8] sm:$0xff] }
  0xf3   : > { %1683 = vperm.xlu1 %2951, %v3594_v23   ;;  %1678 = vperm.xlu0 %2950, %v3589_v22  }
  0xf4   : > { %2843 = vmatpush3.xpose.msk.msra.mxu0 %vm891_vm11, %v361_v24  ;;  %2883 = vmatpush3.xpose.msk.msra.mxu1 %vm891_vm11, %v393_v25 }
  0xf5   : > { %2844 = vmatprep.subr.msk.mxu0 %vm891_vm11, %v376_v26  ;;  %2884 = vmatprep.subr.msk.mxu1 %vm891_vm11, %v408_v27  ;;  %v3605_v26 = vld [vmem:[%s3805_s4] sm:$0x1] }
  0xf6   : > { %3819 = vst [vmem:[#allocation8_spill] sm:$0xff] %v3605_v26 }
  0xf7   : > { %2096 = vperm.xlu1 %2951, %v3605_v26  }
  0xf8   : > { %2845 = vmatpush3.xpose.msk.msra.mxu0 %vm891_vm11, %v360_v28  ;;  %2885 = vmatpush3.xpose.msk.msra.mxu1 %vm891_vm11, %v392_v29 }
  0xf9   : > { %2846 = vmatprep.subr.msk.mxu0 %vm891_vm11, %v375_v30  ;;  %2886 = vmatprep.subr.msk.mxu1 %vm891_vm11, %v407_v31 }
  0xfc   : > { %2847 = vmatpush3.xpose.msk.msra.mxu0 %vm891_vm11, %v359_v32  ;;  %2887 = vmatpush3.xpose.msk.msra.mxu1 %vm891_vm11, %v391_v33 }
  0xfd   : > { %2848 = vmatprep.subr.msk.mxu0 %vm891_vm11, %v374_v34  ;;  %2888 = vmatprep.subr.msk.mxu1 %vm891_vm11, %v406_v35 }
 0x100   : > { %2849 = vmatpush3.xpose.msk.msra.mxu0 %vm891_vm11, %v358_v36  ;;  %2889 = vmatpush3.xpose.msk.msra.mxu1 %vm891_vm11, %v390_v37 }
 0x101   : > { %2850 = vmatprep.subr.msk.mxu0 %vm891_vm11, %v373_v38  ;;  %2890 = vmatprep.subr.msk.mxu1 %vm891_vm11, %v405_v39 }
 0x104   : > { %2851 = vmatpush3.xpose.msk.msra.mxu0 %vm891_vm11, %v357_v40  ;;  %2891 = vmatpush3.xpose.msk.msra.mxu1 %vm891_vm11, %v389_v41 }
 0x105   : > { %2852 = vmatprep.subr.msk.mxu0 %vm891_vm11, %v372_v42  ;;  %2892 = vmatprep.subr.msk.mxu1 %vm891_vm11, %v404_v43 }
 0x108   : > { %2853 = vmatpush3.xpose.msk.msra.mxu0 %vm891_vm11, %v356_v44  ;;  %2893 = vmatpush3.xpose.msk.msra.mxu1 %vm891_vm11, %v388_v45 }
 0x109   : > { %2854 = vmatprep.subr.msk.mxu0 %vm891_vm11, %v371_v46  ;;  %2894 = vmatprep.subr.msk.mxu1 %vm891_vm11, %v403_v47 }
 0x10c   : > { %2855 = vmatpush3.xpose.msk.msra.mxu0 %vm891_vm11, %v355_v48  ;;  %2895 = vmatpush3.xpose.msk.msra.mxu1 %vm891_vm11, %v387_v49 }
 0x10d   : > { %2856 = vmatprep.subr.msk.mxu0 %vm891_vm11, %v370_v50  ;;  %2896 = vmatprep.subr.msk.mxu1 %vm891_vm11, %v402_v51 }
 0x110   : > { %2857 = vmatpush3.xpose.msk.msra.mxu0 %vm891_vm11, %v354_v52  ;;  %2897 = vmatpush3.xpose.msk.msra.mxu1 %vm891_vm11, %v386_v53 }
 0x111   : > { %2858 = vmatprep.subr.msk.mxu0 %vm891_vm11, %v369_v54  ;;  %2898 = vmatprep.subr.msk.mxu1 %vm891_vm11, %v401_v55 }
 0x114   : > { %2859 = vmatpush3.xpose.msk.msra.mxu0 %vm891_vm11, %v353_v56  ;;  %2899 = vmatpush3.xpose.msk.msra.mxu1 %vm891_vm11, %v385_v57 }
 0x117   : > { %2861 = vmatmul.mubr.msk.f32.vlgmr.msra.gmra.mxu0 %vm891_vm11, %v3100_v0  ;;  %2901 = vmatmul.mubr.msk.f32.vlgmr.msra.gmra.mxu1 %vm891_vm11, %v3100_v0 }
 0x118   : > { %2862 = vmatprep.mubr.msk.f32.mxu0 %vm891_vm11, %v3116_v3  ;;  %2902 = vmatprep.mubr.msk.f32.mxu1 %vm891_vm11, %v3116_v3 }
 0x11b   : > { %2863 = vmatmul.mubr.msk.f32.gmra.mxu0 %vm891_vm11, %v3116_v3  ;;  %2903 = vmatmul.mubr.msk.f32.gmra.mxu1 %vm891_vm11, %v3116_v3 }
 0x11c   : > { %2864 = vmatprep.mubr.msk.f32.mxu0 %vm891_vm11, %v3105_v1  ;;  %2904 = vmatprep.mubr.msk.f32.mxu1 %vm891_vm11, %v3105_v1 }
 0x11f   : > { %2865 = vmatmul.mubr.msk.f32.gmra.mxu0 %vm891_vm11, %v3105_v1  ;;  %2905 = vmatmul.mubr.msk.f32.gmra.mxu1 %vm891_vm11, %v3105_v1 }
 0x120   : > { %2866 = vmatprep.mubr.msk.f32.mxu0 %vm891_vm11, %v3121_v4  ;;  %2906 = vmatprep.mubr.msk.f32.mxu1 %vm891_vm11, %v3121_v4 }
 0x123   : > { %2867 = vmatmul.mubr.msk.f32.gmra.mxu0 %vm891_vm11, %v3121_v4  ;;  %2907 = vmatmul.mubr.msk.f32.gmra.mxu1 %vm891_vm11, %v3121_v4 }
 0x124   : > { %1769 = vmatprep.mubr.f32.mxu0 %v3808_v6  ;;  %1858 = vmatprep.mubr.f32.mxu1 %v3808_v6 }
 0x147   : > { %v3546_v0 = vpop.f32.mrf.mxu0  ;;  %v3548_v3 = vpop.f32.mrf.mxu1 }
 0x149   : > { %v3550_v1 = vpop.f32.mrf.mxu0  ;;  %v3552_v58 = vpop.f32.mrf.mxu1 }
 0x14b   : > { %v3554_v59 = vpop.f32.mrf.mxu0  ;;  %v3556_v60 = vpop.f32.mrf.mxu1 }
 0x14d   : > { %v3558_v61 = vpop.f32.mrf.mxu0  ;;  %v3560_v62 = vpop.f32.mrf.mxu1 }
 0x14f   : > { %v613_v4 = vpop.f32.mrf.mxu0  ;;  %v702_v63 = vpop.f32.mrf.mxu1 }
 0x151   : > { %v615_v2 = vpop.f32.mrf.mxu0  ;;  %v704_v7 = vpop.f32.mrf.mxu1 }
 0x153   : > { %v619_v8 = vpop.f32.mrf.mxu0  ;;  %v708_v10 = vpop.f32.mrf.mxu1 }
 0x155   : > { %v621_v11 = vpop.f32.mrf.mxu0  ;;  %v710_v12 = vpop.f32.mrf.mxu1 }
 0x157   : > { %v3562_v13 = vpop.f32.mrf.mxu0  ;;  %v3564_v14 = vpop.f32.mrf.mxu1 }
 0x158   : > { %3817 = vst [vmem:[#allocation6_spill] sm:$0xff] %v3562_v13  ;;  %3818 = vst [vmem:[#allocation7_spill] sm:$0xff] %v3564_v14 }
 0x159   : > { %v3566_v15 = vpop.f32.mrf.mxu0  ;;  %v3568_v16 = vpop.f32.mrf.mxu1 }
 0x15b   : > { %v3582_v20 = vpop.f32.mrf.mxu0  ;;  %v3584_v21 = vpop.f32.mrf.mxu1 }
 0x15d   : > { %v3598_v24 = vpop.f32.mrf.mxu0  ;;  %v3600_v25 = vpop.f32.mrf.mxu1 }
 0x15f   : > { %v3608_v27 = vpop.f32.mrf.mxu0  ;;  %v3610_v28 = vpop.f32.mrf.mxu1 }
 0x161   : > { %v3612_v29 = vpop.f32.mrf.mxu0  ;;  %v3614_v30 = vpop.f32.mrf.mxu1 }
 0x163   : > { %v3616_v31 = vpop.f32.mrf.mxu0  ;;  %v3618_v32 = vpop.f32.mrf.mxu1 }
 0x165   : > { %v3620_v33 = vpop.f32.mrf.mxu0  ;;  %v3622_v34 = vpop.f32.mrf.mxu1 }
 0x197   : > { %v1350_v35 = vpop.f32.mrf.mxu0  ;;  %v1439_v36 = vpop.f32.mrf.mxu1 }
 0x199   : > { %v1352_v37 = vpop.f32.mrf.mxu0  ;;  %v1441_v38 = vpop.f32.mrf.mxu1 }
 0x19b   : > { %v1356_v39 = vpop.f32.mrf.mxu0  ;;  %v1445_v40 = vpop.f32.mrf.mxu1 }
 0x19c   : > { %v1357_v14 = vadd.f32 %v1356_v39, %v3554_v59  ;;  %v1446_v13 = vadd.f32 %v1445_v40, %v3556_v60 }
 0x19d   : > { %v1358_v41 = vpop.f32.mrf.mxu0  ;;  %v1447_v42 = vpop.f32.mrf.mxu1 }
 0x19e   : > { %v1359_v9 = vadd.f32 %v1358_v41, %v3558_v61  ;;  %v1448_v6 = vadd.f32 %v1447_v42, %v3560_v62  ;;  %v1351_v61 = vadd.f32 %v1350_v35, %v3546_v0  ;;  %v1440_v62 = vadd.f32 %v1439_v36, %v3548_v3 }
 0x19f   : > { %v1362_v43 = vpop.f32.mrf.mxu0  ;;  %v1451_v44 = vpop.f32.mrf.mxu1 }
 0x1a0   : > { %v1363_v57 = vadd.f32 %v1362_v43, %v613_v4  ;;  %v1452_v19 = vadd.f32 %v1451_v44, %v702_v63  ;;  %v1649_v59 = vmax.f32 %v1359_v9, 0.0  ;;  %v1651_v60 = vmax.f32 %v1448_v6, 0.0 }
 0x1a1   : > { %v1364_v45 = vpop.f32.mrf.mxu0  ;;  %v1453_v46 = vpop.f32.mrf.mxu1  ;;  %v1642_v0 = vmax.f32 %v1440_v62, 0.0  ;;  %v3820_v6 = vmov 0.0  }
 0x1a2   : > { %v1365_v53 = vadd.f32 %v1364_v45, %v615_v2  ;;  %v1454_v54 = vadd.f32 %v1453_v46, %v704_v7  ;;  %v1442_v2 = vadd.f32 %v1441_v38, %v3552_v58  ;;  %v1656_v4 = vmax.f32 %v1363_v57, 0.0 }
 0x1a3   : > { %v1368_v47 = vpop.f32.mrf.mxu0  ;;  %v1457_v48 = vpop.f32.mrf.mxu1  ;;  %v1658_v63 = vmax.f32 %v1452_v19, 0.0 }
 0x1a4   : > { %v1369_v49 = vadd.f32 %v1368_v47, %v619_v8  ;;  %v1458_v50 = vadd.f32 %v1457_v48, %v708_v10  ;;  %v1353_v47 = vadd.f32 %v1352_v37, %v3550_v1  ;;  %v1657_v7 = vmax.f32 %v1365_v53, 0.0 }
 0x1a5   : > { %v1370_v51 = vpop.f32.mrf.mxu0  ;;  %v1459_v52 = vpop.f32.mrf.mxu1  ;;  %v1650_v1 = vmax.f32 %v1446_v13, 0.0  ;;  %v1643_v37 = vmax.f32 %v1442_v2, 0.0 }
 0x1a6   : > { %v1371_v55 = vadd.f32 %v1370_v51, %v621_v11  ;;  %v1460_v56 = vadd.f32 %v1459_v52, %v710_v12  ;;  %v1664_v8 = vmax.f32 %v1369_v49, 0.0  ;;  %v1666_v10 = vmax.f32 %v1458_v50, 0.0 }
 0x1a7   : > { %v1659_v11 = vmax.f32 %v1454_v54, 0.0  ;;  %v1648_v12 = vmax.f32 %v1357_v14, 0.0  ;;  %v1641_v58 = vmax.f32 %v1353_v47, 0.0  ;;  %v3822_v47 = vld [vmem:[#allocation7_spill] sm:$0xff] }
 0x1a8   : > { %v1665_v5 = vmax.f32 %v1371_v55, 0.0  ;;  %v1667_v26 = vmax.f32 %v1460_v56, 0.0 }
 0x1aa   : > { %1729 = vmatprep.subr.mxu0 %v1665_v5  ;;  %1818 = vmatprep.subr.mxu1 %v1667_v26  ;;  %v1640_v5 = vmax.f32 %v1351_v61, 0.0 }
 0x1ab   : > { %1730 = vmatpush1.msra.mxu0 %v1664_v8  ;;  %1819 = vmatpush1.msra.mxu1 %v1666_v10 }
 0x1ac   : > { %1731 = vmatprep.subr.mxu0 %v1657_v7  ;;  %1820 = vmatprep.subr.mxu1 %v1659_v11 }
 0x1ad   : > { %1732 = vmatpush1.msra.mxu0 %v1656_v4  ;;  %1821 = vmatpush1.msra.mxu1 %v1658_v63 }
 0x1ae   : > { %1733 = vmatprep.subr.mxu0 %v1649_v59  ;;  %1822 = vmatprep.subr.mxu1 %v1651_v60 }
 0x1af   : > { %1734 = vmatpush1.msra.mxu0 %v1648_v12  ;;  %1823 = vmatpush1.msra.mxu1 %v1650_v1  ;;  %v3696_v12 = vpop.permute.xlu1 %1688 }
 0x1b0   : > { %1735 = vmatprep.subr.mxu0 %v1641_v58  ;;  %1824 = vmatprep.subr.mxu1 %v1643_v37  ;;  %v3698_v37 = vpop.permute.xlu0 %1693 }
 0x1b1   : > { %1736 = vmatpush1.msra.mxu0 %v1640_v5  ;;  %1825 = vmatpush1.msra.mxu1 %v1642_v0 }
 0x1b2   : > { %2720 = vmatmul.mubr.msk.f32.vlgmr.msra.gmra.mxu0 %vm1696_vm12, %v3589_v22  ;;  %2724 = vmatmul.mubr.msk.f32.vlgmr.msra.gmra.mxu1 %vm1696_vm12, %v3589_v22 }
 0x1b3   : > { %1775 = vmatprep.mubr.f32.mxu0 %v3820_v6  ;;  %1864 = vmatprep.mubr.f32.mxu1 %v3820_v6 }
 0x1b6   : > { %2721 = vmatmul.mubr.msk.f32.gmra.mxu0 %vm1696_vm12, %v3594_v23  ;;  %2725 = vmatmul.mubr.msk.f32.gmra.mxu1 %vm1696_vm12, %v3594_v23 }
 0x1b7   : > { %1781 = vmatprep.mubr.f32.mxu0 %v3820_v6  ;;  %1870 = vmatprep.mubr.f32.mxu1 %v3820_v6 }
 0x1ba   : > { %2722 = vmatmul.mubr.msk.f32.gmra.mxu0 %vm1696_vm12, %v3573_v17  ;;  %2726 = vmatmul.mubr.msk.f32.gmra.mxu1 %vm1696_vm12, %v3573_v17 }
 0x1bb   : > { %1787 = vmatprep.mubr.f32.mxu0 %v3820_v6  ;;  %1876 = vmatprep.mubr.f32.mxu1 %v3820_v6 }
 0x1be   : > { %2723 = vmatmul.mubr.msk.f32.gmra.mxu0 %vm1696_vm12, %v3578_v18  ;;  %2727 = vmatmul.mubr.msk.f32.gmra.mxu1 %vm1696_vm12, %v3578_v18 }
 0x1bf   : > { %1947 = vmatprep.mubr.f32.mxu0 %v3820_v6  ;;  %2036 = vmatprep.mubr.f32.mxu1 %v3820_v6 }
 0x1d7   : > { %v1528_v9 = vpop.f32.mrf.mxu0  ;;  %v1617_v3 = vpop.f32.mrf.mxu1 }
 0x1d9   : > { %v1530_v13 = vpop.f32.mrf.mxu0  ;;  %v1619_v14 = vpop.f32.mrf.mxu1 }
 0x1db   : > { %v1534_v26 = vpop.f32.mrf.mxu0  ;;  %v1623_v35 = vpop.f32.mrf.mxu1 }
 0x1dc   : > { %v1535_v19 = vadd.f32 %v1534_v26, %v3582_v20 }
 0x1dd   : > { %v1536_v36 = vpop.f32.mrf.mxu0  ;;  %v1625_v38 = vpop.f32.mrf.mxu1 }
 0x1de   : > { %v1537_v56 = vadd.f32 %v1536_v36, %v3598_v24  ;;  %v1652_v11 = vmax.f32 %v1535_v19, 0.0 }
 0x1df   : > { %v1540_v39 = vpop.f32.mrf.mxu0  ;;  %v1629_v40 = vpop.f32.mrf.mxu1 }
 0x1e0   : > { %v1541_v54 = vadd.f32 %v1540_v39, %v3608_v27  ;;  %v1630_v55 = vadd.f32 %v1629_v40, %v3610_v28  ;;  %v3821_v28 = vld [vmem:[#allocation6_spill] sm:$0xff]  ;;  %v1653_v20 = vmax.f32 %v1537_v56, 0.0 }
 0x1e1   : > { %v1542_v41 = vpop.f32.mrf.mxu0  ;;  %v1631_v42 = vpop.f32.mrf.mxu1  ;;  %v1529_v24 = vadd.f32 %v1528_v9, %v3821_v28 }
 0x1e2   : > { %v1543_v50 = vadd.f32 %v1542_v41, %v3612_v29  ;;  %v1632_v51 = vadd.f32 %v1631_v42, %v3614_v30  ;;  %v1624_v29 = vadd.f32 %v1623_v35, %v3584_v21  ;;  %v1660_v2 = vmax.f32 %v1541_v54, 0.0 }
 0x1e3   : > { %v1546_v43 = vpop.f32.mrf.mxu0  ;;  %v1635_v44 = vpop.f32.mrf.mxu1  ;;  %v1662_v7 = vmax.f32 %v1630_v55, 0.0  ;;  %v1644_v62 = vmax.f32 %v1529_v24, 0.0 }
 0x1e4   : > { %v1547_v45 = vadd.f32 %v1546_v43, %v3616_v31  ;;  %v1636_v46 = vadd.f32 %v1635_v44, %v3618_v32  ;;  %v1626_v31 = vadd.f32 %v1625_v38, %v3600_v25  ;;  %v1661_v10 = vmax.f32 %v1543_v50, 0.0 }
 0x1e5   : > { %v1548_v48 = vpop.f32.mrf.mxu0  ;;  %v1637_v49 = vpop.f32.mrf.mxu1  ;;  %v1663_v27 = vmax.f32 %v1632_v51, 0.0  ;;  %v1618_v25 = vadd.f32 %v1617_v3, %v3822_v47 }
 0x1e6   : > { %v1549_v52 = vadd.f32 %v1548_v48, %v3620_v33  ;;  %v1638_v53 = vadd.f32 %v1637_v49, %v3622_v34  ;;  %v1668_v8 = vmax.f32 %v1547_v45, 0.0  ;;  %v1670_v30 = vmax.f32 %v1636_v46, 0.0  ;;  %v3700_v3 = vpop.permute.xlu1 %1683 }
 0x1e7   : > { %v1531_v33 = vadd.f32 %v1530_v13, %v3566_v15  ;;  %v1620_v34 = vadd.f32 %v1619_v14, %v3568_v16  ;;  %v1655_v21 = vmax.f32 %v1626_v31, 0.0  ;;  %v1654_v15 = vmax.f32 %v1624_v29, 0.0  ;;  %v3702_v13 = vpop.permute.xlu0 %1678 }
 0x1e8   : > { %v1669_v57 = vmax.f32 %v1549_v52, 0.0  ;;  %v1671_v32 = vmax.f32 %v1638_v53, 0.0  ;;  %v1646_v4 = vmax.f32 %v1618_v25, 0.0  ;;  %v3823_v25 = vld [vmem:[#allocation8_spill] sm:$0xff] }
 0x1e9   : > { %v1645_v16 = vmax.f32 %v1531_v33, 0.0  ;;  %v1647_v61 = vmax.f32 %v1620_v34, 0.0 }
 0x1ea   : > { %1907 = vmatprep.subr.mxu0 %v1669_v57  ;;  %1996 = vmatprep.subr.mxu1 %v1671_v32 }
 0x1eb   : > { %1908 = vmatpush1.msra.mxu0 %v1668_v8  ;;  %1997 = vmatpush1.msra.mxu1 %v1670_v30 }
 0x1ec   : > { %1909 = vmatprep.subr.mxu0 %v1661_v10  ;;  %1998 = vmatprep.subr.mxu1 %v1663_v27 }
 0x1ed   : > { %1910 = vmatpush1.msra.mxu0 %v1660_v2  ;;  %1999 = vmatpush1.msra.mxu1 %v1662_v7 }
 0x1ee   : > { %1911 = vmatprep.subr.mxu0 %v1653_v20  ;;  %2000 = vmatprep.subr.mxu1 %v1655_v21 }
 0x1ef   : > { %1912 = vmatpush1.msra.mxu0 %v1652_v11  ;;  %2001 = vmatpush1.msra.mxu1 %v1654_v15 }
 0x1f0   : > { %1913 = vmatprep.subr.mxu0 %v1645_v16  ;;  %2002 = vmatprep.subr.mxu1 %v1647_v61 }
 0x1f1   : > { %1914 = vmatpush1.msra.mxu0 %v1644_v62  ;;  %2003 = vmatpush1.msra.mxu1 %v1646_v4 }
 0x1f2   : > { %2728 = vmatmul.mubr.msk.f32.vlgmr.msra.gmra.mxu0 %vm1696_vm12, %v3589_v22  ;;  %2732 = vmatmul.mubr.msk.f32.vlgmr.msra.gmra.mxu1 %vm1696_vm12, %v3589_v22 }
 0x1f3   : > { %1953 = vmatprep.mubr.f32.mxu0 %v3820_v6  ;;  %2042 = vmatprep.mubr.f32.mxu1 %v3820_v6 }
 0x1f6   : > { %2729 = vmatmul.mubr.msk.f32.gmra.mxu0 %vm1696_vm12, %v3594_v23  ;;  %2733 = vmatmul.mubr.msk.f32.gmra.mxu1 %vm1696_vm12, %v3594_v23 }
 0x1f7   : > { %1959 = vmatprep.mubr.f32.mxu0 %v3820_v6  ;;  %2048 = vmatprep.mubr.f32.mxu1 %v3820_v6 }
 0x1fa   : > { %2730 = vmatmul.mubr.msk.f32.gmra.mxu0 %vm1696_vm12, %v3573_v17  ;;  %2734 = vmatmul.mubr.msk.f32.gmra.mxu1 %vm1696_vm12, %v3573_v17 }
 0x1fb   : > { %1965 = vmatprep.mubr.f32.mxu0 %v3820_v6  ;;  %2054 = vmatprep.mubr.f32.mxu1 %v3820_v6 }
 0x1fe   : > { %2731 = vmatmul.mubr.msk.f32.gmra.mxu0 %vm1696_vm12, %v3578_v18  ;;  %2735 = vmatmul.mubr.msk.f32.gmra.mxu1 %vm1696_vm12, %v3578_v18 }
 0x1ff   : > { %2169 = vmatprep.mubr.f32.mxu0 %v3820_v6  ;;  %2240 = vmatprep.mubr.f32.mxu1 %v3820_v6 }
 0x272   : > { %v1771_v22 = vpop.f32.mrf.mxu0  ;;  %v1860_v23 = vpop.f32.mrf.mxu1 }
 0x273   : > { %v1772_v29 = vadd.f32 %v1771_v22, %v3702_v13  ;;  %v1861_v8 = vadd.f32 %v1860_v23, %v3702_v13 }
 0x274   : > { %v1773_v63 = vpop.f32.mrf.mxu0  ;;  %v1862_v59 = vpop.f32.mrf.mxu1 }
 0x275   : > { %v1774_v44 = vadd.f32 %v1773_v63, %v3702_v13  ;;  %v1863_v45 = vadd.f32 %v1862_v59, %v3702_v13  ;;  %v2061_v24 = vmax.f32 %v1772_v29, 0.0  ;;  %v2063_v47 = vmax.f32 %v1861_v8, 0.0 }
 0x276   : > { %v1777_v60 = vpop.f32.mrf.mxu0  ;;  %v1866_v17 = vpop.f32.mrf.mxu1 }
 0x277   : > { %v1778_v53 = vadd.f32 %v1777_v60, %v3700_v3  ;;  %v1867_v54 = vadd.f32 %v1866_v17, %v3700_v3  ;;  %v2062_v27 = vmax.f32 %v1774_v44, 0.0  ;;  %v2064_v28 = vmax.f32 %v1863_v45, 0.0 }
 0x278   : > { %v1779_v1 = vpop.f32.mrf.mxu0  ;;  %v1868_v58 = vpop.f32.mrf.mxu1 }
 0x279   : > { %v1780_v49 = vadd.f32 %v1779_v1, %v3700_v3  ;;  %v1869_v50 = vadd.f32 %v1868_v58, %v3700_v3  ;;  %v2069_v34 = vmax.f32 %v1778_v53, 0.0  ;;  %v2071_v10 = vmax.f32 %v1867_v54, 0.0 }
 0x27a   : > { %v1783_v5 = vpop.f32.mrf.mxu0  ;;  %v1872_v0 = vpop.f32.mrf.mxu1 }
 0x27b   : > { %v1784_v42 = vadd.f32 %v1783_v5, %v3696_v12  ;;  %v1873_v43 = vadd.f32 %v1872_v0, %v3696_v12  ;;  %v2070_v30 = vmax.f32 %v1780_v49, 0.0  ;;  %v2072_v33 = vmax.f32 %v1869_v50, 0.0 }
 0x27c   : > { %v1785_v9 = vpop.f32.mrf.mxu0  ;;  %v1874_v18 = vpop.f32.mrf.mxu1 }
 0x27d   : > { %v1786_v38 = vadd.f32 %v1785_v9, %v3696_v12  ;;  %v1875_v39 = vadd.f32 %v1874_v18, %v3696_v12  ;;  %v2077_v32 = vmax.f32 %v1784_v42, 0.0  ;;  %v2079_v19 = vmax.f32 %v1873_v43, 0.0 }
 0x27e   : > { %v1789_v14 = vpop.f32.mrf.mxu0  ;;  %v1878_v26 = vpop.f32.mrf.mxu1 }
 0x27f   : > { %v1790_v35 = vadd.f32 %v1789_v14, %v3698_v37  ;;  %v1879_v36 = vadd.f32 %v1878_v26, %v3698_v37  ;;  %v2078_v31 = vmax.f32 %v1786_v38, 0.0  ;;  %v2080_v57 = vmax.f32 %v1875_v39, 0.0 }
 0x280   : > { %v1791_v40 = vpop.f32.mrf.mxu0  ;;  %v1880_v41 = vpop.f32.mrf.mxu1 }
 0x281   : > { %v1792_v46 = vadd.f32 %v1791_v40, %v3698_v37  ;;  %v1881_v48 = vadd.f32 %v1880_v41, %v3698_v37  ;;  %v2085_v51 = vmax.f32 %v1790_v35, 0.0  ;;  %v2087_v52 = vmax.f32 %v1879_v36, 0.0 }
 0x283   : > { %v2086_v55 = vmax.f32 %v1792_v46, 0.0  ;;  %v2088_v56 = vmax.f32 %v1881_v48, 0.0 }
 0x285   : > { %2129 = vmatprep.subr.mxu0 %v2086_v55  ;;  %2200 = vmatprep.subr.mxu1 %v2088_v56 }
 0x286   : > { %2130 = vmatpush1.msra.mxu0 %v2085_v51  ;;  %2201 = vmatpush1.msra.mxu1 %v2087_v52 }
 0x287   : > { %2131 = vmatprep.subr.mxu0 %v2078_v31  ;;  %2202 = vmatprep.subr.mxu1 %v2080_v57  ;;  %v2097_v57 = vpop.permute.xlu1 %2096 }
 0x288   : > { %2132 = vmatpush1.msra.mxu0 %v2077_v32  ;;  %2203 = vmatpush1.msra.mxu1 %v2079_v19  ;;  %v3017_v32 = vmov 1966171168  }
 0x289   : > { %2133 = vmatprep.subr.mxu0 %v2070_v30  ;;  %2204 = vmatprep.subr.mxu1 %v2072_v33  ;;  %v2402_v19 = vunpack.c.l.s4 %v3017_v32  ;;  %v3824_v30 = vld [vmem:[#allocation5_spill] sm:$0xff] }
 0x28a   : > { %2134 = vmatpush1.msra.mxu0 %v2069_v34  ;;  %2205 = vmatpush1.msra.mxu1 %v2071_v10  ;;  %v3825_v33 = vsub.s32 0, %v3824_v30 }
 0x28b   : > { %2135 = vmatprep.subr.mxu0 %v2062_v27  ;;  %2206 = vmatprep.subr.mxu1 %v2064_v28  ;;  %v2403_v27 = vunpack.c.0.s8 %v2402_v19 }
 0x28c   : > { %2136 = vmatpush1.msra.mxu0 %v2061_v24  ;;  %2207 = vmatpush1.msra.mxu1 %v2063_v47  ;;  %v2102_v34 = vrot.slane %v2097_v57, %v3825_v33 }
 0x28d   : > { %2736 = vmatmul.mubr.msk.f32.vlgmr.msra.gmra.mxu0 %vm1696_vm12, %v3823_v25  ;;  %2737 = vmatmul.mubr.msk.f32.vlgmr.msra.gmra.mxu1 %vm1696_vm12, %v3823_v25 }
 0x28e   : > { %2311 = vmatprep.mubr.f32.mxu0 %v3820_v6  ;;  %2382 = vmatprep.mubr.f32.mxu1 %v3820_v6 }
 0x2b2   : > { %v1949_v2 = vpop.f32.mrf.mxu0  ;;  %v2038_v7 = vpop.f32.mrf.mxu1 }
 0x2b3   : > { %v2039_v46 = vadd.f32 %v2038_v7, %v3702_v13  ;;  %v2406_v7 = vsub.s32 %v2403_v27, %v3824_v30 }
 0x2b4   : > { %v1951_v20 = vpop.f32.mrf.mxu0  ;;  %v2040_v21 = vpop.f32.mrf.mxu1 }
 0x2b5   : > { %v1952_v43 = vadd.f32 %v1951_v20, %v3702_v13  ;;  %v2067_v56 = vmax.f32 %v2039_v46, 0.0 }
 0x2b6   : > { %v1955_v11 = vpop.f32.mrf.mxu0  ;;  %v2044_v15 = vpop.f32.mrf.mxu1 }
 0x2b7   : > { %v1956_v39 = vadd.f32 %v1955_v11, %v3700_v3  ;;  %v2045_v40 = vadd.f32 %v2044_v15, %v3700_v3  ;;  %v2066_v53 = vmax.f32 %v1952_v43, 0.0 }
 0x2b8   : > { %v1957_v16 = vpop.f32.mrf.mxu0  ;;  %v2046_v61 = vpop.f32.mrf.mxu1 }
 0x2b9   : > { %v1958_v26 = vadd.f32 %v1957_v16, %v3700_v3  ;;  %v2047_v35 = vadd.f32 %v2046_v61, %v3700_v3  ;;  %v2073_v51 = vmax.f32 %v1956_v39, 0.0  ;;  %v2075_v52 = vmax.f32 %v2045_v40, 0.0 }
 0x2ba   : > { %v1961_v62 = vpop.f32.mrf.mxu0  ;;  %v2050_v4 = vpop.f32.mrf.mxu1 }
 0x2bb   : > { %v1962_v18 = vadd.f32 %v1961_v62, %v3696_v12  ;;  %v2051_v14 = vadd.f32 %v2050_v4, %v3696_v12  ;;  %v2074_v50 = vmax.f32 %v1958_v26, 0.0  ;;  %v2076_v3 = vmax.f32 %v2047_v35, 0.0 }
 0x2bc   : > { %v1963_v22 = vpop.f32.mrf.mxu0  ;;  %v2052_v23 = vpop.f32.mrf.mxu1 }
 0x2bd   : > { %v1964_v58 = vadd.f32 %v1963_v22, %v3696_v12  ;;  %v2053_v5 = vadd.f32 %v2052_v23, %v3696_v12  ;;  %v1950_v12 = vadd.f32 %v1949_v2, %v3702_v13  ;;  %v2081_v48 = vmax.f32 %v1962_v18, 0.0 }
 0x2be   : > { %v1967_v63 = vpop.f32.mrf.mxu0  ;;  %v2056_v59 = vpop.f32.mrf.mxu1  ;;  %v2083_v49 = vmax.f32 %v2051_v14, 0.0 }
 0x2bf   : > { %v1968_v60 = vadd.f32 %v1967_v63, %v3698_v37  ;;  %v2057_v17 = vadd.f32 %v2056_v59, %v3698_v37  ;;  %v2082_v44 = vmax.f32 %v1964_v58, 0.0  ;;  %v2084_v45 = vmax.f32 %v2053_v5, 0.0 }
 0x2c0   : > { %v1969_v1 = vpop.f32.mrf.mxu0  ;;  %v2058_v6 = vpop.f32.mrf.mxu1  ;;  %v2065_v55 = vmax.f32 %v1950_v12, 0.0 }
 0x2c1   : > { %v1970_v0 = vadd.f32 %v1969_v1, %v3698_v37  ;;  %v2059_v9 = vadd.f32 %v2058_v6, %v3698_v37  ;;  %v2089_v41 = vmax.f32 %v1968_v60, 0.0  ;;  %v2091_v42 = vmax.f32 %v2057_v17, 0.0 }
 0x2c2   : > { %v2041_v37 = vadd.f32 %v2040_v21, %v3702_v13 }
 0x2c3   : > { %v2090_v36 = vmax.f32 %v1970_v0, 0.0  ;;  %v2092_v38 = vmax.f32 %v2059_v9, 0.0 }
 0x2c4   : > { %v2068_v54 = vmax.f32 %v2041_v37, 0.0 }
 0x2c5   : > { %2271 = vmatprep.subr.mxu0 %v2090_v36  ;;  %2342 = vmatprep.subr.mxu1 %v2092_v38 }
 0x2c6   : > { %2272 = vmatpush1.msra.mxu0 %v2089_v41  ;;  %2343 = vmatpush1.msra.mxu1 %v2091_v42 }
 0x2c7   : > { %2273 = vmatprep.subr.mxu0 %v2082_v44  ;;  %2344 = vmatprep.subr.mxu1 %v2084_v45 }
 0x2c8   : > { %2274 = vmatpush1.msra.mxu0 %v2081_v48  ;;  %2345 = vmatpush1.msra.mxu1 %v2083_v49 }
 0x2c9   : > { %2275 = vmatprep.subr.mxu0 %v2074_v50  ;;  %2346 = vmatprep.subr.mxu1 %v2076_v3 }
 0x2ca   : > { %2276 = vmatpush1.msra.mxu0 %v2073_v51  ;;  %2347 = vmatpush1.msra.mxu1 %v2075_v52 }
 0x2cb   : > { %2277 = vmatprep.subr.mxu0 %v2066_v53  ;;  %2348 = vmatprep.subr.mxu1 %v2068_v54 }
 0x2cc   : > { %2278 = vmatpush1.msra.mxu0 %v2065_v55  ;;  %2349 = vmatpush1.msra.mxu1 %v2067_v56 }
 0x2cd   : > { %2738 = vmatmul.mubr.msk.f32.vlgmr.msra.gmra.mxu0 %vm1696_vm12, %v3823_v25  ;;  %2739 = vmatmul.mubr.msk.f32.vlgmr.msra.gmra.mxu1 %vm1696_vm12, %v3823_v25 }
 0x34d   : > { %v2171_v13 = vpop.f32.mrf.mxu0  ;;  %v2242_v31 = vpop.f32.mrf.mxu1 }
 0x34e   : > { %v2172_v24 = vadd.f32 %v2171_v13, %v2102_v34  ;;  %v2243_v47 = vadd.f32 %v2242_v31, %v2102_v34 }
 0x34f   : > { %v2173_v29 = vpop.f32.mrf.mxu0  ;;  %v2244_v8 = vpop.f32.mrf.mxu1 }
 0x350   : > { %v2174_v10 = vadd.f32 %v2173_v29, %v2102_v34  ;;  %v2245_v28 = vadd.f32 %v2244_v8, %v2102_v34 }
 0x352   : > { %v2397_v2 = vcombine.low %v2172_v24, %v2174_v10  ;;  %v2398_v25 = vcombine.low %v2243_v47, %v2245_v28 }
 0x354   : > { %v2407_v11 = vrot.slane %v2397_v2, %v2406_v7  ;;  %v2414_v15 = vrot.slane %v2398_v25, %v2406_v7 }
 0x356   : > { %v2429_v60 = vcombine.low %v2407_v11, %v2414_v15 }
 0x358   : > { %v2437_v58 = vrot.slane %v2429_v60, %v2406_v7 }
 0x38d   : > { %v2313_v20 = vpop.f32.mrf.mxu0  ;;  %v2384_v21 = vpop.f32.mrf.mxu1 }
 0x38e   : > { %v2314_v62 = vadd.f32 %v2313_v20, %v2102_v34  ;;  %v2385_v4 = vadd.f32 %v2384_v21, %v2102_v34 }
 0x38f   : > { %v2315_v16 = vpop.f32.mrf.mxu0  ;;  %v2386_v61 = vpop.f32.mrf.mxu1 }
 0x390   : > { %v2316_v22 = vadd.f32 %v2315_v16, %v2102_v34  ;;  %v2387_v23 = vadd.f32 %v2386_v61, %v2102_v34 }
 0x392   : > { %v2399_v63 = vcombine.low %v2314_v62, %v2316_v22  ;;  %v2400_v59 = vcombine.low %v2385_v4, %v2387_v23 }
 0x394   : > { %v2421_v17 = vrot.slane %v2399_v63, %v2406_v7  ;;  %v2428_v1 = vrot.slane %v2400_v59, %v2406_v7 }
 0x396   : > { %v2430_v6 = vcombine.low %v2421_v17, %v2428_v1 }
 0x398   : > { %v2444_v5 = vrot.slane %v2430_v6, %v2406_v7  ;;  %2455 = sbr.rel (!%p3087_p5) target bundleno = 951 (0x3b7), region = 44 }
 0x39a   : > { %v2445_v0 = vcombine.low %v2437_v58, %v2444_v5 }
 0x39c   : > { %2447 = vst [vmem:[%s256_s6] sm:$0xff] %v2445_v0 }
 0x39d   : > { %s3831_s8 = smov (!%p2458_p12, %s2457_s8), 8 }
 0x39e   : > { %s3759_s22 = sshll.u32 %s3831_s8, 4 }
 0x39f   : > { %s2462_s10 = ssub.s32 128, %s3759_s22 }
 0x3a0   : > { %2463 = vsyncadd %s3754_s7, %s2462_s10  ;;  %p2743_p13 = scmp.ne.s32.totalorder %s3759_s22, 0  ;;  %s2466_s28 = scalar_lea.hbm %s3806_s5, %s3183_s25 }
 0x3a1   : > { %s2468_s13 = sshll.u32 %s256_s6, 4  ;;  %s3018_s9 = smov [#allocation2]   ;;  %s2469_s13 = int_to_ptr.vmem [resolvable:$true] %s2468_s13 }
 0x3a2   : > { %s2952_s14 = scalar_lea.vmem %s2469_s13, %s3759_s22  ;;  %s2956_s15 = sshll.u32 %s3018_s9, 4  ;;  %s2957_s15 = int_to_ptr.vmem [resolvable:$false] %s2956_s15 }
 0x3a3   : > { %p2953_p0 = scmp.ne.s32.totalorder %s2469_s13, %s2952_s14  ;;  %s2958_s16 = scalar_lea.vmem %s2957_s15, 256 }
 0x3a4   : > { %p2959_p3 = scmp.lt.s32.totalorder %s2469_s13, %s2957_s15  ;;  %p2960_p4 = scmp.lt.s32.totalorder %s2958_s16, %s2952_s14 }
 0x3a5   : > { %p2954_p1 = pnand %p2953_p0, %p2743_p13 }
 0x3a6   : > { %p2961_p5 = por %p2960_p4, %p2959_p3 }
 0x3a7   : > { %p2955_p2 = pneg %p2954_p1 }
 0x3a9   : > { %p2962_p7 = pnand %p2961_p5, %p2955_p2 }
 0x3ab   : > { %2965 = shalt.err (!%p2962_p7)
}
 0x3ac   : > { %s2966_s17 = scalar_lea.hbm %s2466_s28, %s3759_s22  ;;  %s2970_s26 = scalar_lea.hbm %s3806_s5, 272 }
 0x3ad   : > { %p2967_p8 = scmp.ne.s32.totalorder %s2466_s28, %s2966_s17  ;;  %p2971_p11 = scmp.lt.s32.totalorder %s2466_s28, %s3806_s5 }
 0x3ae   : > { %p2972_p12 = scmp.lt.s32.totalorder %s2970_s26, %s2966_s17 }
 0x3af   : > { %p2968_p9 = pnand %p2967_p8, %p2743_p13 }
 0x3b0   : > { %p2973_p0 = por %p2972_p12, %p2971_p11 }
 0x3b1   : > { %p2969_p10 = pneg %p2968_p9 }
 0x3b3   : > { %p2974_p1 = pnand %p2973_p0, %p2969_p10 }
 0x3b5   : > { %2977 = shalt.err (!%p2974_p1)
}
 0x3b6   : > { %2471 = dma.vmem_to_hbm [thread:$0]  (%p2743_p13), %s2469_s13, %s3759_s22, %s2466_s28, %s3754_s7  }
 0x3b7 PF: > { %p2913_p2 = scmp.ge.s32.totalorder %s3012_s21, 2  ;;  %s2480_s8 = sand.u32 1, %s3000_s18  }
 0x3b8   : > { %s2481_s10 = scalar_lea.sflag [#allocation3], %s2480_s8 }
 0x3b9   : > { %p2910_p3 = pnand %p2913_p2, %p3091_p6 }
 0x3bb   : > { %p2911_p4 = pneg %p2910_p3 }
 0x3bd   : > { %2995 = dma.done.wait (%p2911_p4), %s2481_s10, 128  }
 0x3be   : > { %2997 = vsyncadd (%p2911_p4), %s2481_s10, 4294967168  ;;  %p15_p5 = scmp.ge.s32.totalorder %s3074_s24, 5   ;;  %s3826_s18 = smov %s3004_s19 }
 0x3bf   : > { %s3827_s19 = smov %s3008_s20  ;;  %s3828_s20 = smov %s3085_s27 }
 0x3c0   : > { %s3829_s21 = smov %s3074_s24  ;;  %17 = sbr.rel (!%p15_p5) target bundleno = 3 (0x3), region = 78 }
 0x3c5   :  { %2486 = vsyncpa [#allocation3], 1 }
 0x3c6   :  { %2488 = vsyncpa [#allocation3 + $0x1], 1 }

</bundles_post_ra>
